<compile_context>
chip_gen: v5e
topology: v5e:2x2
jax: 0.10.0
libtpu: 0.0.40
codegen_flags: <defaults>
</compile_context>

<pallas_src>
import jax
import jax.numpy as jnp
from jax import lax
from jax.experimental import pallas as pl
from jax.experimental.pallas import tpu as pltpu  # noqa: F401  (TPU-specific tuning hooks)

# ----------------------------- configuration --------------------------------
N_WAY = 2          # classes per episode
N_SUPPORT = 2      # support shots per class
N_QUERY = 2        # query shots per class
C_IN = 4           # input channels
H = 16
W = 16
FEAT_DIM = 32      # feature_extractor.final_feat_dim  (Cout of the conv)
KSIZE = 3

LANE = 128         # TPU lane width
SUBLANE = 8        # TPU sublane width (f32)


def _round_up(v, m):
    return ((v + m - 1) // m) * m


def _pad2d(a, rows, cols):
    r, c = a.shape
    return jnp.pad(a, ((0, rows - r), (0, cols - c)))


# ------------------------ Pallas kernel: conv backbone -----------------------
def conv_feat_kernel(patch_ref, w_ref, b_ref, feat_ref):
    # patch_ref: (N_pad*H*W, K_pad) bf16   whole-batch im2col rows (lane padded)
    # w_ref    : (K_pad, C_pad)     bf16   conv weight as a matmul (lane padded)
    # b_ref    : (1, C_pad)         f32    bias (padded lanes are 0)
    # feat_ref : (N_pad, C_pad)     f32    GAP(ReLU(conv)) features, one row/image
    acc = jnp.dot(patch_ref[...], w_ref[...],
                  preferred_element_type=jnp.float32)        # single MXU matmul, f32 acc
    acc = jnp.maximum(acc + b_ref[...], 0.0)                 # bias + ReLU (VPU)
    n = feat_ref.shape[0]
    hw = acc.shape[0] // n
    # (N_pad*HW, C_pad) -> (N_pad, HW, C_pad), mean over spatial positions.
    feat_ref[...] = jnp.mean(acc.reshape(n, hw, acc.shape[1]), axis=1)


def feature_extractor_forward(x_nchw, w, b):
    """Equivalent of self.feature_extractor.forward(x): Conv3x3(pad=1) -> ReLU -> GAP.

    One pallas_call for the entire batch (no per-image grid)."""
    N, C, Hh, Ww = x_nchw.shape
    HW = Hh * Ww
    Cout = w.shape[0]
    K = C * KSIZE * KSIZE

    # im2col glue (plain XLA layout plumbing): rows flatten as (c, kh, kw) to
    # match the OIHW weight flatten.
    xp = jnp.pad(x_nchw, ((0, 0), (0, 0), (1, 1), (1, 1)))
    cols = [xp[:, :, dh:dh + Hh, dw:dw + Ww]
            for dh in range(KSIZE) for dw in range(KSIZE)]
    patches = jnp.stack(cols, axis=2)                 # (N, C, 9, H, W)
    patches = patches.transpose(0, 3, 4, 1, 2)        # (N, H, W, C, 9)
    patches = patches.reshape(N * HW, K)

    # Pad to lane-dense, (8,128)-aligned tiles; bf16 matmul inputs, f32 accumulate.
    K_pad = _round_up(K, LANE)
    C_pad = _round_up(Cout, LANE)
    N_pad = _round_up(N, SUBLANE)

    patches_p = _pad2d(patches.astype(jnp.float32),
                       N_pad * HW, K_pad).astype(jnp.bfloat16)
    w_p = _pad2d(w.reshape(Cout, K).T.astype(jnp.float32),
                 K_pad, C_pad).astype(jnp.bfloat16)
    b_p = _pad2d(b.reshape(1, Cout).astype(jnp.float32), 1, C_pad)

    feats_p = pl.pallas_call(
        conv_feat_kernel,
        out_shape=jax.ShapeDtypeStruct((N_pad, C_pad), jnp.float32),
    )(patches_p, w_p, b_p)
    return feats_p[:N, :Cout]


# --------------------- Pallas kernel: fused metric heads ---------------------
def metric_kernel(x_ref, y_ref, dist_ref, cos_ref):
    # x_ref: (M_pad, D_pad) f32 queries (zero padded)
    # y_ref: (N_pad, D_pad) f32 prototypes (zero padded; N_pad lane-dense)
    # dist_ref / cos_ref: (M_pad, N_pad) f32
    x = x_ref[...]
    y = y_ref[...]
    dn = (((1,), (1,)), ((), ()))      # contract last dims of both (NT matmul, no transpose)

    xy = lax.dot_general(x, y, dn, preferred_element_type=jnp.float32)       # (M, N) MXU
    x2 = jnp.sum(x * x, axis=1, keepdims=True)                               # (M, 1) VPU/XLU
    yy = y * y
    # ||y_j||^2 broadcast over rows via an MXU matmul (avoids a sublane->lane transpose).
    y2_bcast = lax.dot_general(jnp.ones_like(x), yy, dn,
                               preferred_element_type=jnp.float32)           # (M, N) MXU

    # euclidean_dist = ||x||^2 + ||y||^2 - 2 x.y   (clamp tiny negatives from cancellation)
    dist_ref[...] = jnp.maximum(x2 + y2_bcast - 2.0 * xy, 0.0)

    # cosine_similarity with torch eps=1e-12 semantics:
    #   cos = (x . y) / (max(||x||,1e-12) * max(||y||,1e-12))
    # Zero-padded rows/cols give xy == 0, so the huge rsqrt(eps) factors are harmless.
    inv_xn = lax.rsqrt(jnp.maximum(x2, 1e-24))                               # (M, 1) EUP
    inv_yn = lax.rsqrt(jnp.maximum(y2_bcast, 1e-24))                         # (M, N) EUP
    cos_ref[...] = xy * inv_xn * inv_yn


def metric_heads(x, y):
    """Fused euclidean_dist + cosine_similarity: x (m,d), y (n,d) -> ((m,n), (m,n))."""
    m, d = x.shape
    n, d2 = y.shape
    assert d == d2
    M_pad = _round_up(m, SUBLANE)
    N_pad = _round_up(n, LANE)          # lane-dense output width
    D_pad = _round_up(d, LANE)

    xp = _pad2d(x.astype(jnp.float32), M_pad, D_pad)
    yp = _pad2d(y.astype(jnp.float32), N_pad, D_pad)

    dist_p, cos_p = pl.pallas_call(
        metric_kernel,
        out_shape=(jax.ShapeDtypeStruct((M_pad, N_pad), jnp.float32),
                   jax.ShapeDtypeStruct((M_pad, N_pad), jnp.float32)),
    )(xp, yp)
    return dist_p[:m, :n], cos_p[:m, :n]


def euclidean_dist(x, y):
    return metric_heads(x, y)[0]


def cosine_similarity(x, y):
    return metric_heads(x, y)[1]


# ------------------------- module-level glue (JAX) ---------------------------
def parse_feature(x, w, b, n_way, n_support, n_query):
    """x: (n_way, n_support + n_query, C, H, W) -> (z_support, z_query)."""
    x_flat = x.reshape(n_way * (n_support + n_query), *x.shape[2:])
    z_all = feature_extractor_forward(x_flat, w, b)
    z_all = z_all.reshape(n_way, n_support + n_query, -1)
    return z_all[:, :n_support], z_all[:, n_support:]


# TODO(synk): add_feature_noise uses host-side numpy RNG as training-time data
# augmentation (not part of the forward pass); not implemented as a kernel.
# TODO(synk): mahalanobis_dist (torch.cov + matrix inverse) has no clean tiny-kernel
# equivalent and is not used by forward(); left unimplemented.

if __name__ == "__main__":
    key = jax.random.PRNGKey(0)
    kx, kw, kb = jax.random.split(key, 3)

    # deterministic "checkpoint": conv weight (Cout, Cin, 3, 3) + bias
    w = 0.1 * jax.random.normal(kw, (FEAT_DIM, C_IN, KSIZE, KSIZE), jnp.float32)
    b = 0.01 * jax.random.normal(kb, (FEAT_DIM,), jnp.float32)

    # episode input: (n_way, n_support + n_query, C, H, W)
    x = jax.random.normal(kx, (N_WAY, N_SUPPORT + N_QUERY, C_IN, H, W), jnp.float32)

    # ---- forward(x): feature extractor on the flattened batch (1 pallas_call) ----
    x_flat = x.reshape(N_WAY * (N_SUPPORT + N_QUERY), C_IN, H, W)
    feats = jax.block_until_ready(feature_extractor_forward(x_flat, w, b))

    # correctness check: reference uses the same bf16-quantized inputs/weights as the
    # kernel's MXU matmul (accumulation is f32 in both).
    xq = x_flat.astype(jnp.bfloat16).astype(jnp.float32)
    wq = w.astype(jnp.bfloat16).astype(jnp.float32)
    ref_conv = lax.conv_general_dilated(
        xq, wq, window_strides=(1, 1), padding="SAME",
        dimension_numbers=("NCHW", "OIHW", "NCHW"))
    ref_feats = jnp.mean(jnp.maximum(ref_conv + b[None, :, None, None], 0.0),
                         axis=(2, 3))
    assert jnp.allclose(feats, ref_feats, rtol=1e-4, atol=1e-4), "conv mismatch"

    # ---- parse_feature + metric heads (prototypical-style usage, 1 fused pallas_call) ----
    # parse_feature(x, ...) would recompute the extractor exactly as the torch module does;
    # here we reuse the already-computed features (identical result, no extra launch).
    z_all = feats.reshape(N_WAY, N_SUPPORT + N_QUERY, FEAT_DIM)
    z_support, z_query = z_all[:, :N_SUPPORT], z_all[:, N_SUPPORT:]
    protos = jnp.mean(z_support, axis=1)                      # (n_way, feat_dim)
    q = z_query.reshape(N_WAY * N_QUERY, FEAT_DIM)            # (m, feat_dim)

    dists, cosim = jax.block_until_ready(metric_heads(q, protos))

    # reference checks for the fused metric kernel
    ref_d = jnp.sum((q[:, None, :] - protos[None, :, :]) ** 2, axis=2)
    qn = q / jnp.maximum(jnp.linalg.norm(q, axis=1, keepdims=True), 1e-12)
    pn = protos / jnp.maximum(jnp.linalg.norm(protos, axis=1, keepdims=True), 1e-12)
    ref_c = qn @ pn.T
    assert jnp.allclose(dists, ref_d, rtol=1e-4, atol=1e-4), "euclid mismatch"
    assert jnp.allclose(cosim, ref_c, rtol=1e-4, atol=1e-4), "cosine mismatch"

    print("KERNEL_OK")
</pallas_src>

<mosaic_0001>
module attributes {stable_mosaic.version = 11 : i64} {
  func.func @conv_feat_kernel(%arg0: memref<2048x128xbf16, #tpu.memory_space<vmem>>, %arg1: memref<128x128xbf16, #tpu.memory_space<vmem>>, %arg2: memref<1x128xf32, #tpu.memory_space<vmem>>, %arg3: memref<8x128xf32, #tpu.memory_space<vmem>>) attributes {dimension_semantics = [], scalar_prefetch = 0 : i64, scratch_operands = 0 : i64, tpu.core_type = #tpu.core_type<tc>} {
    %c0 = arith.constant 0 : index
    %c0_0 = arith.constant 0 : index
    %0 = vector.load %arg0[%c0, %c0_0] : memref<2048x128xbf16, #tpu.memory_space<vmem>>, vector<2048x128xbf16>
    %c0_1 = arith.constant 0 : index
    %c0_2 = arith.constant 0 : index
    %1 = vector.load %arg1[%c0_1, %c0_2] : memref<128x128xbf16, #tpu.memory_space<vmem>>, vector<128x128xbf16>
    %cst = arith.constant dense<0.000000e+00> : vector<2048x128xf32>
    %2 = tpu.matmul %0, %1, %cst {dimension_numbers = #tpu.dot_dimension_numbers<[1], [0], [0], [1], [0, 0, 1, 1], [], []>} : vector<2048x128xbf16>, vector<128x128xbf16>, vector<2048x128xf32> -> vector<2048x128xf32>
    %c0_3 = arith.constant 0 : index
    %c0_4 = arith.constant 0 : index
    %3 = vector.load %arg2[%c0_3, %c0_4] : memref<1x128xf32, #tpu.memory_space<vmem>>, vector<1x128xf32>
    %4 = vector.broadcast %3 : vector<1x128xf32> to vector<2048x128xf32>
    %5 = arith.addf %2, %4 : vector<2048x128xf32>
    %cst_5 = arith.constant 0.000000e+00 : f32
    %6 = vector.broadcast %cst_5 : f32 to vector<2048x128xf32>
    %7 = arith.maximumf %5, %6 : vector<2048x128xf32>
    %8 = vector.shape_cast %7 : vector<2048x128xf32> to vector<8x256x128xf32>
    %cst_6 = arith.constant dense<0.000000e+00> : vector<8x128xf32>
    %9 = vector.multi_reduction <add>, %8, %cst_6 [1] : vector<8x256x128xf32> to vector<8x128xf32>
    %cst_7 = arith.constant 2.560000e+02 : f32
    %10 = vector.broadcast %cst_7 : f32 to vector<8x128xf32>
    %11 = arith.divf %9, %10 : vector<8x128xf32>
    %c0_8 = arith.constant 0 : index
    %c0_9 = arith.constant 0 : index
    %12 = vector.load %arg3[%c0_8, %c0_9] : memref<8x128xf32, #tpu.memory_space<vmem>>, vector<8x128xf32>
    tpu.vector_store %arg3[%c0_8, %c0_9], %11 {strides = array<i32>} : memref<8x128xf32, #tpu.memory_space<vmem>>, vector<8x128xf32>,
    return
  }
}

</mosaic_0001>

<bundles_post_ra>
// kernel: tpu_custom_call.1
= control target key start
LH: loop header
LB: loop body
LE: loop exit
PB: predicated region body
PF: predicated region fallthrough
CT: control target
= control target key end

     0   :  { %8 = vsyncpa [#allocation3], 0  ;;  %s3600_s0 = inlined_call_operand.hbm [shape: bf16[2048,128], index: 0, kind: input, shape index: {}]   ;;  %s3601_s1 = inlined_call_operand.hbm [shape: bf16[128,128], index: 1, kind: input, shape index: {}]   ;;  %s3602_s2 = inlined_call_operand.vmem [shape: f32[1,128], index: 2, kind: input, shape index: {}]   ;;  %s3603_s3 = inlined_call_operand.hbm [shape: f32[8,128], index: 3, kind: output, shape index: {}]  }
   0x1   :  { %9 = vsyncpa [#allocation6], 0 }
   0x2   :  { %10 = vsyncpa [#allocation4], 0  ;;  %s15_s14 = sshll.u32 %s3600_s0, 4  ;;  %s3190_s15 = smov [#allocation2]   ;;  %s16_s14 = int_to_ptr.hbm [resolvable:$true] %s15_s14 }
   0x3   :  { %s17_s16 = sshll.u32 %s3190_s15, 4  ;;  %s28_s19 = sshll.u32 %s3601_s1, 4  ;;  %s18_s16 = int_to_ptr.vmem [resolvable:$true] %s17_s16  ;;  %s29_s19 = int_to_ptr.hbm [resolvable:$true] %s28_s19 }
   0x4   :  { %s3191_s20 = smov 64   ;;  %s3192_s21 = smov 4  }
   0x5   :  { %23 = dma.hbm_to_vmem [thread:$0]  %s16_s14, 16384, %s18_s16, [#allocation3], %s3191_s20, %s3191_s20, %s3192_s21  }
   0x6   :  { %s3193_s22 = smov [#allocation5]  }
   0x7   :  { %s30_s23 = sshll.u32 %s3193_s22, 4  ;;  %s31_s23 = int_to_ptr.vmem [resolvable:$true] %s30_s23 }
   0x8   :  { %36 = dma.hbm_to_vmem [thread:$0]  %s29_s19, 1024, %s31_s23, [#allocation6], %s3191_s20, %s3191_s20, %s3192_s21  }
   0x9   :  { %3184 = dma.done.wait [#allocation3], 16384  }
   0xa   :  { %3185 = vsyncadd [#allocation3], 4294950912 }
   0xb   :  { %3186 = dma.done.wait [#allocation6], 1024  }
   0xc   :  { %3187 = vsyncadd [#allocation6], 4294966272  ;;  %v3076_v0 = vld [vmem:[#allocation5 + $0x38] sm:$0xff]  ;;  %v3075_v1 = vld [vmem:[#allocation5 + $0x30] sm:$0xff]  ;;  %vm2363_vm1 = vcmask 1041409   ;;  %vm2365_vm2 = vcmask 1042434  }
   0xd   :  { %1139 = vmatpush.bf16.msra.mxu0 %v3076_v0  ;;  %3077 = vmatpush.bf16.msra.mxu1 %v3076_v0  ;;  %v3074_v2 = vld [vmem:[#allocation5 + $0x28] sm:$0xff]  ;;  %v3073_v3 = vld [vmem:[#allocation5 + $0x20] sm:$0xff]  ;;  %v3072_v4 = vld [vmem:[#allocation5 + $0x18] sm:$0xff]  ;;  %vm2367_vm3 = vcmask 1043459   ;;  %vm2369_vm4 = vcmask 1044484   ;;  %vm2371_vm5 = vcmask 1045509  }
   0xe   :  { %3078 = vmatpush.bf16.msra.mxu2 %v3076_v0  ;;  %3079 = vmatpush.bf16.msra.mxu3 %v3076_v0  ;;  %v3071_v5 = vld [vmem:[#allocation5 + $0x10] sm:$0xff]  ;;  %v3070_v6 = vld [vmem:[#allocation5 + $0x8] sm:$0xff]  ;;  %v3069_v7 = vld [vmem:[#allocation5] sm:$0xff]  ;;  %vm2373_vm6 = vcmask 1046534   ;;  %s2386_s4 = sshll.u32 %s3603_s3, 4  ;;  %vm2375_vm7 = vcmask 1047559   ;;  %s2387_s4 = int_to_ptr.hbm [resolvable:$true] %s2386_s4 }
   0xf   :  { %v2941_v8 = vld [vmem:[#allocation2] sm:$0xff]  ;;  %v2942_v12 = vld [vmem:[#allocation2 + $0x8] sm:$0xff]  ;;  %v2943_v16 = vld [vmem:[#allocation2 + $0x10] sm:$0xff] }
  0x10   :  { %v2973_v9 = vld [vmem:[#allocation2 + $0x100] sm:$0xff]  ;;  %v2974_v13 = vld [vmem:[#allocation2 + $0x108] sm:$0xff]  ;;  %v2975_v17 = vld [vmem:[#allocation2 + $0x110] sm:$0xff] }
  0x11   :  { %1140 = vmatpush.bf16.msra.mxu0 %v3075_v1  ;;  %3080 = vmatpush.bf16.msra.mxu1 %v3075_v1  ;;  %v3005_v10 = vld [vmem:[#allocation2 + $0x200] sm:$0xff]  ;;  %v3006_v14 = vld [vmem:[#allocation2 + $0x208] sm:$0xff]  ;;  %v3007_v18 = vld [vmem:[#allocation2 + $0x210] sm:$0xff] }
  0x12   :  { %3081 = vmatpush.bf16.msra.mxu2 %v3075_v1  ;;  %3082 = vmatpush.bf16.msra.mxu3 %v3075_v1  ;;  %v3037_v11 = vld [vmem:[#allocation2 + $0x300] sm:$0xff]  ;;  %v3038_v15 = vld [vmem:[#allocation2 + $0x308] sm:$0xff]  ;;  %v3039_v19 = vld [vmem:[#allocation2 + $0x310] sm:$0xff] }
  0x13   :  { %v2944_v20 = vld [vmem:[#allocation2 + $0x18] sm:$0xff]  ;;  %v2945_v24 = vld [vmem:[#allocation2 + $0x20] sm:$0xff]  ;;  %v2946_v28 = vld [vmem:[#allocation2 + $0x28] sm:$0xff] }
  0x14   :  { %v2976_v21 = vld [vmem:[#allocation2 + $0x118] sm:$0xff]  ;;  %v2977_v25 = vld [vmem:[#allocation2 + $0x120] sm:$0xff]  ;;  %v2978_v29 = vld [vmem:[#allocation2 + $0x128] sm:$0xff] }
  0x15   :  { %1141 = vmatpush.bf16.msra.mxu0 %v3074_v2  ;;  %3083 = vmatpush.bf16.msra.mxu1 %v3074_v2  ;;  %v3008_v22 = vld [vmem:[#allocation2 + $0x218] sm:$0xff]  ;;  %v3009_v26 = vld [vmem:[#allocation2 + $0x220] sm:$0xff]  ;;  %v3010_v30 = vld [vmem:[#allocation2 + $0x228] sm:$0xff] }
  0x16   :  { %3084 = vmatpush.bf16.msra.mxu2 %v3074_v2  ;;  %3085 = vmatpush.bf16.msra.mxu3 %v3074_v2  ;;  %v3040_v23 = vld [vmem:[#allocation2 + $0x318] sm:$0xff]  ;;  %v3041_v27 = vld [vmem:[#allocation2 + $0x320] sm:$0xff]  ;;  %v3042_v31 = vld [vmem:[#allocation2 + $0x328] sm:$0xff] }
  0x17   :  { %v2947_v32 = vld [vmem:[#allocation2 + $0x30] sm:$0xff]  ;;  %v2948_v36 = vld [vmem:[#allocation2 + $0x38] sm:$0xff]  ;;  %v2949_v40 = vld [vmem:[#allocation2 + $0x40] sm:$0xff] }
  0x18   :  { %v2979_v33 = vld [vmem:[#allocation2 + $0x130] sm:$0xff]  ;;  %v2980_v37 = vld [vmem:[#allocation2 + $0x138] sm:$0xff]  ;;  %v2981_v41 = vld [vmem:[#allocation2 + $0x140] sm:$0xff] }
  0x19   :  { %1142 = vmatpush.bf16.msra.mxu0 %v3073_v3  ;;  %3086 = vmatpush.bf16.msra.mxu1 %v3073_v3  ;;  %v3011_v34 = vld [vmem:[#allocation2 + $0x230] sm:$0xff]  ;;  %v3012_v38 = vld [vmem:[#allocation2 + $0x238] sm:$0xff]  ;;  %v3013_v44 = vld [vmem:[#allocation2 + $0x240] sm:$0xff] }
  0x1a   :  { %3087 = vmatpush.bf16.msra.mxu2 %v3073_v3  ;;  %3088 = vmatpush.bf16.msra.mxu3 %v3073_v3  ;;  %v3043_v35 = vld [vmem:[#allocation2 + $0x330] sm:$0xff]  ;;  %v3044_v39 = vld [vmem:[#allocation2 + $0x338] sm:$0xff]  ;;  %v3045_v45 = vld [vmem:[#allocation2 + $0x340] sm:$0xff] }
  0x1b   :  { %v3225_v46 = vld [vmem:[%s3602_s2] ss:$0 sm:$0xff]  ;;  %v2950_v1 = vld [vmem:[#allocation2 + $0x48] sm:$0xff] }
  0x1c   :  { %v2982_v2 = vld [vmem:[#allocation2 + $0x148] sm:$0xff] }
  0x1d   :  { %1143 = vmatpush.bf16.msra.mxu0 %v3072_v4  ;;  %3089 = vmatpush.bf16.msra.mxu1 %v3072_v4 }
  0x1e   :  { %3090 = vmatpush.bf16.msra.mxu2 %v3072_v4  ;;  %3091 = vmatpush.bf16.msra.mxu3 %v3072_v4 }
  0x21   :  { %1144 = vmatpush.bf16.msra.mxu0 %v3071_v5  ;;  %3092 = vmatpush.bf16.msra.mxu1 %v3071_v5 }
  0x22   :  { %3093 = vmatpush.bf16.msra.mxu2 %v3071_v5  ;;  %3094 = vmatpush.bf16.msra.mxu3 %v3071_v5 }
  0x25   :  { %1145 = vmatpush.bf16.msra.mxu0 %v3070_v6  ;;  %3095 = vmatpush.bf16.msra.mxu1 %v3070_v6 }
  0x26   :  { %3096 = vmatpush.bf16.msra.mxu2 %v3070_v6  ;;  %3097 = vmatpush.bf16.msra.mxu3 %v3070_v6 }
  0x29   :  { %1146 = vmatpush.bf16.msra.mxu0 %v3069_v7  ;;  %3098 = vmatpush.bf16.msra.mxu1 %v3069_v7 }
  0x2a   :  { %3099 = vmatpush.bf16.msra.mxu2 %v3069_v7  ;;  %3100 = vmatpush.bf16.msra.mxu3 %v3069_v7  ;;  %v3014_v7 = vld [vmem:[#allocation2 + $0x248] sm:$0xff] }
  0x2c   :  { %1147 = vmatmul.bf16.vlgmr.msra.gmra.mxu0 %v2941_v8  ;;  %1307 = vmatmul.bf16.vlgmr.msra.gmra.mxu1 %v2973_v9  ;;  %v3046_v8 = vld [vmem:[#allocation2 + $0x348] sm:$0xff] }
  0x2d   :  { %1467 = vmatmul.bf16.vlgmr.msra.gmra.mxu2 %v3005_v10  ;;  %1627 = vmatmul.bf16.vlgmr.msra.gmra.mxu3 %v3037_v11 }
  0x3c   :  { %1152 = vmatmul.bf16.gmra.mxu0 %v2942_v12  ;;  %1312 = vmatmul.bf16.gmra.mxu1 %v2974_v13 }
  0x3d   :  { %1472 = vmatmul.bf16.gmra.mxu2 %v3006_v14  ;;  %1632 = vmatmul.bf16.gmra.mxu3 %v3038_v15 }
  0x4c   :  { %1157 = vmatmul.bf16.gmra.mxu0 %v2943_v16  ;;  %1317 = vmatmul.bf16.gmra.mxu1 %v2975_v17 }
  0x4d   :  { %1477 = vmatmul.bf16.gmra.mxu2 %v3007_v18  ;;  %1637 = vmatmul.bf16.gmra.mxu3 %v3039_v19 }
  0x5c   :  { %1162 = vmatmul.bf16.gmra.mxu0 %v2944_v20  ;;  %1322 = vmatmul.bf16.gmra.mxu1 %v2976_v21 }
  0x5d   :  { %1482 = vmatmul.bf16.gmra.mxu2 %v3008_v22  ;;  %1642 = vmatmul.bf16.gmra.mxu3 %v3040_v23 }
  0x6c   :  { %1167 = vmatmul.bf16.gmra.mxu0 %v2945_v24  ;;  %1327 = vmatmul.bf16.gmra.mxu1 %v2977_v25 }
  0x6d   :  { %1487 = vmatmul.bf16.gmra.mxu2 %v3009_v26  ;;  %1647 = vmatmul.bf16.gmra.mxu3 %v3041_v27 }
  0x7c   :  { %1172 = vmatmul.bf16.gmra.mxu0 %v2946_v28  ;;  %1332 = vmatmul.bf16.gmra.mxu1 %v2978_v29 }
  0x7d   :  { %1492 = vmatmul.bf16.gmra.mxu2 %v3010_v30  ;;  %1652 = vmatmul.bf16.gmra.mxu3 %v3042_v31 }
  0x8c   :  { %1177 = vmatmul.bf16.gmra.mxu0 %v2947_v32  ;;  %1337 = vmatmul.bf16.gmra.mxu1 %v2979_v33 }
  0x8d   :  { %1497 = vmatmul.bf16.gmra.mxu2 %v3011_v34  ;;  %1657 = vmatmul.bf16.gmra.mxu3 %v3043_v35 }
  0x9c   :  { %1182 = vmatmul.bf16.gmra.mxu0 %v2948_v36  ;;  %1342 = vmatmul.bf16.gmra.mxu1 %v2980_v37 }
  0x9d   :  { %1502 = vmatmul.bf16.gmra.mxu2 %v3012_v38  ;;  %1662 = vmatmul.bf16.gmra.mxu3 %v3044_v39  ;;  %v2951_v39 = vld [vmem:[#allocation2 + $0x50] sm:$0xff] }
  0xa9   :  { %v1148_v42 = vpop.f32.mrf.mxu0  ;;  %v1308_v43 = vpop.f32.mrf.mxu1 }
  0xaa   :  { %v1149_v47 = vadd.f32 %v3225_v46, %v1148_v42  ;;  %v1309_v48 = vadd.f32 %v3225_v46, %v1308_v43 }
  0xac   :  { %1187 = vmatmul.bf16.gmra.mxu0 %v2949_v40  ;;  %1347 = vmatmul.bf16.gmra.mxu1 %v2981_v41  ;;  %v1788_v55 = vmax.f32 %v1149_v47, 0.0  ;;  %v1852_v56 = vmax.f32 %v1309_v48, 0.0  ;;  %v2983_v40 = vld [vmem:[#allocation2 + $0x150] sm:$0xff] }
  0xad   :  { %1507 = vmatmul.bf16.gmra.mxu2 %v3013_v44  ;;  %1667 = vmatmul.bf16.gmra.mxu3 %v3045_v45  ;;  %v3015_v45 = vld [vmem:[#allocation2 + $0x250] sm:$0xff] }
  0xae   :  { %v3047_v47 = vld [vmem:[#allocation2 + $0x350] sm:$0xff] }
  0xb0   :  { %v1468_v49 = vpop.f32.mrf.mxu2  ;;  %v1628_v50 = vpop.f32.mrf.mxu3 }
  0xb1   :  { %v1150_v51 = vpop.f32.mrf.mxu0  ;;  %v1310_v52 = vpop.f32.mrf.mxu1  ;;  %v1469_v61 = vadd.f32 %v3225_v46, %v1468_v49  ;;  %v1629_v62 = vadd.f32 %v3225_v46, %v1628_v50 }
  0xb2   :  { %v1151_v53 = vadd.f32 %v3225_v46, %v1150_v51  ;;  %v1311_v54 = vadd.f32 %v3225_v46, %v1310_v52 }
  0xb3   :  { %v1916_v11 = vmax.f32 %v1469_v61, 0.0  ;;  %v1980_v12 = vmax.f32 %v1629_v62, 0.0 }
  0xb4   :  { %v1789_v57 = vmax.f32 %v1151_v53, 0.0  ;;  %v1853_v58 = vmax.f32 %v1311_v54, 0.0 }
  0xb6   :  { %v2044_v59 = vadd.f32 %v1789_v57, %v1788_v55  ;;  %v2118_v60 = vadd.f32 %v1853_v58, %v1852_v56 }
  0xb8   :  { %v1470_v63 = vpop.f32.mrf.mxu2  ;;  %v1630_v0 = vpop.f32.mrf.mxu3 }
  0xb9   :  { %v1471_v3 = vadd.f32 %v3225_v46, %v1470_v63  ;;  %v1631_v4 = vadd.f32 %v3225_v46, %v1630_v0  ;;  %v1153_v5 = vpop.f32.mrf.mxu0  ;;  %v1313_v6 = vpop.f32.mrf.mxu1 }
  0xba   :  { %v1154_v9 = vadd.f32 %v3225_v46, %v1153_v5  ;;  %v1314_v10 = vadd.f32 %v3225_v46, %v1313_v6 }
  0xbb   :  { %v1917_v13 = vmax.f32 %v1471_v3, 0.0  ;;  %v1981_v14 = vmax.f32 %v1631_v4, 0.0 }
  0xbc   :  { %v1790_v15 = vmax.f32 %v1154_v9, 0.0  ;;  %v1854_v16 = vmax.f32 %v1314_v10, 0.0  ;;  %1192 = vmatmul.bf16.gmra.mxu0 %v2950_v1  ;;  %1352 = vmatmul.bf16.gmra.mxu1 %v2982_v2 }
  0xbd   :  { %v2192_v17 = vadd.f32 %v1917_v13, %v1916_v11  ;;  %v2266_v18 = vadd.f32 %v1981_v14, %v1980_v12  ;;  %1512 = vmatmul.bf16.gmra.mxu2 %v3014_v7  ;;  %1672 = vmatmul.bf16.gmra.mxu3 %v3046_v8  ;;  %v2952_v12 = vld [vmem:[#allocation2 + $0x58] sm:$0xff] }
  0xbe   :  { %v2045_v19 = vadd.f32 %v2044_v59, %v1790_v15  ;;  %v2119_v20 = vadd.f32 %v2118_v60, %v1854_v16  ;;  %v2984_v13 = vld [vmem:[#allocation2 + $0x158] sm:$0xff] }
  0xc0   :  { %v1473_v21 = vpop.f32.mrf.mxu2  ;;  %v1633_v22 = vpop.f32.mrf.mxu3 }
  0xc1   :  { %v1474_v23 = vadd.f32 %v3225_v46, %v1473_v21  ;;  %v1634_v24 = vadd.f32 %v3225_v46, %v1633_v22  ;;  %v1155_v25 = vpop.f32.mrf.mxu0  ;;  %v1315_v26 = vpop.f32.mrf.mxu1 }
  0xc2   :  { %v1156_v27 = vadd.f32 %v3225_v46, %v1155_v25  ;;  %v1316_v28 = vadd.f32 %v3225_v46, %v1315_v26 }
  0xc3   :  { %v1918_v29 = vmax.f32 %v1474_v23, 0.0  ;;  %v1982_v30 = vmax.f32 %v1634_v24, 0.0 }
  0xc4   :  { %v1791_v31 = vmax.f32 %v1156_v27, 0.0  ;;  %v1855_v32 = vmax.f32 %v1316_v28, 0.0 }
  0xc5   :  { %v2193_v33 = vadd.f32 %v2192_v17, %v1918_v29  ;;  %v2267_v34 = vadd.f32 %v2266_v18, %v1982_v30  ;;  %v3016_v18 = vld [vmem:[#allocation2 + $0x258] sm:$0xff] }
  0xc6   :  { %v2046_v35 = vadd.f32 %v2045_v19, %v1791_v31  ;;  %v2120_v36 = vadd.f32 %v2119_v20, %v1855_v32  ;;  %v3048_v19 = vld [vmem:[#allocation2 + $0x358] sm:$0xff] }
  0xc8   :  { %v1475_v37 = vpop.f32.mrf.mxu2  ;;  %v1635_v38 = vpop.f32.mrf.mxu3 }
  0xc9   :  { %v1476_v41 = vadd.f32 %v3225_v46, %v1475_v37  ;;  %v1636_v42 = vadd.f32 %v3225_v46, %v1635_v38  ;;  %v1158_v43 = vpop.f32.mrf.mxu0  ;;  %v1318_v44 = vpop.f32.mrf.mxu1 }
  0xca   :  { %v1159_v48 = vadd.f32 %v3225_v46, %v1158_v43  ;;  %v1319_v49 = vadd.f32 %v3225_v46, %v1318_v44 }
  0xcb   :  { %v1919_v50 = vmax.f32 %v1476_v41, 0.0  ;;  %v1983_v51 = vmax.f32 %v1636_v42, 0.0 }
  0xcc   :  { %v1792_v52 = vmax.f32 %v1159_v48, 0.0  ;;  %v1856_v53 = vmax.f32 %v1319_v49, 0.0  ;;  %1197 = vmatmul.bf16.gmra.mxu0 %v2951_v39  ;;  %1357 = vmatmul.bf16.gmra.mxu1 %v2983_v40  ;;  %v2953_v49 = vld [vmem:[#allocation2 + $0x60] sm:$0xff] }
  0xcd   :  { %v2194_v54 = vadd.f32 %v2193_v33, %v1919_v50  ;;  %v2268_v55 = vadd.f32 %v2267_v34, %v1983_v51  ;;  %1517 = vmatmul.bf16.gmra.mxu2 %v3015_v45  ;;  %1677 = vmatmul.bf16.gmra.mxu3 %v3047_v47  ;;  %v2985_v50 = vld [vmem:[#allocation2 + $0x160] sm:$0xff] }
  0xce   :  { %v2047_v56 = vadd.f32 %v2046_v35, %v1792_v52  ;;  %v2121_v57 = vadd.f32 %v2120_v36, %v1856_v53 }
  0xd0   :  { %v1478_v58 = vpop.f32.mrf.mxu2  ;;  %v1638_v59 = vpop.f32.mrf.mxu3 }
  0xd1   :  { %v1479_v60 = vadd.f32 %v3225_v46, %v1478_v58  ;;  %v1639_v61 = vadd.f32 %v3225_v46, %v1638_v59  ;;  %v1160_v62 = vpop.f32.mrf.mxu0  ;;  %v1320_v63 = vpop.f32.mrf.mxu1 }
  0xd2   :  { %v1161_v0 = vadd.f32 %v3225_v46, %v1160_v62  ;;  %v1321_v1 = vadd.f32 %v3225_v46, %v1320_v63 }
  0xd3   :  { %v1920_v2 = vmax.f32 %v1479_v60, 0.0  ;;  %v1984_v3 = vmax.f32 %v1639_v61, 0.0 }
  0xd4   :  { %v1793_v4 = vmax.f32 %v1161_v0, 0.0  ;;  %v1857_v5 = vmax.f32 %v1321_v1, 0.0 }
  0xd5   :  { %v2195_v6 = vadd.f32 %v2194_v54, %v1920_v2  ;;  %v2269_v7 = vadd.f32 %v2268_v55, %v1984_v3  ;;  %v3017_v55 = vld [vmem:[#allocation2 + $0x260] sm:$0xff] }
  0xd6   :  { %v2048_v8 = vadd.f32 %v2047_v56, %v1793_v4  ;;  %v2122_v9 = vadd.f32 %v2121_v57, %v1857_v5  ;;  %v3049_v56 = vld [vmem:[#allocation2 + $0x360] sm:$0xff] }
  0xd8   :  { %v1480_v10 = vpop.f32.mrf.mxu2  ;;  %v1640_v11 = vpop.f32.mrf.mxu3 }
  0xd9   :  { %v1481_v14 = vadd.f32 %v3225_v46, %v1480_v10  ;;  %v1641_v15 = vadd.f32 %v3225_v46, %v1640_v11  ;;  %v1163_v16 = vpop.f32.mrf.mxu0  ;;  %v1323_v17 = vpop.f32.mrf.mxu1 }
  0xda   :  { %v1164_v20 = vadd.f32 %v3225_v46, %v1163_v16  ;;  %v1324_v21 = vadd.f32 %v3225_v46, %v1323_v17 }
  0xdb   :  { %v1921_v22 = vmax.f32 %v1481_v14, 0.0  ;;  %v1985_v23 = vmax.f32 %v1641_v15, 0.0 }
  0xdc   :  { %v1794_v24 = vmax.f32 %v1164_v20, 0.0  ;;  %v1858_v25 = vmax.f32 %v1324_v21, 0.0  ;;  %1202 = vmatmul.bf16.gmra.mxu0 %v2952_v12  ;;  %1362 = vmatmul.bf16.gmra.mxu1 %v2984_v13  ;;  %v2954_v21 = vld [vmem:[#allocation2 + $0x68] sm:$0xff] }
  0xdd   :  { %v2196_v26 = vadd.f32 %v2195_v6, %v1921_v22  ;;  %v2270_v27 = vadd.f32 %v2269_v7, %v1985_v23  ;;  %1522 = vmatmul.bf16.gmra.mxu2 %v3016_v18  ;;  %1682 = vmatmul.bf16.gmra.mxu3 %v3048_v19  ;;  %v2986_v22 = vld [vmem:[#allocation2 + $0x168] sm:$0xff] }
  0xde   :  { %v2049_v28 = vadd.f32 %v2048_v8, %v1794_v24  ;;  %v2123_v29 = vadd.f32 %v2122_v9, %v1858_v25 }
  0xe0   :  { %v1483_v30 = vpop.f32.mrf.mxu2  ;;  %v1643_v31 = vpop.f32.mrf.mxu3 }
  0xe1   :  { %v1484_v32 = vadd.f32 %v3225_v46, %v1483_v30  ;;  %v1644_v33 = vadd.f32 %v3225_v46, %v1643_v31  ;;  %v1165_v34 = vpop.f32.mrf.mxu0  ;;  %v1325_v35 = vpop.f32.mrf.mxu1 }
  0xe2   :  { %v1166_v36 = vadd.f32 %v3225_v46, %v1165_v34  ;;  %v1326_v37 = vadd.f32 %v3225_v46, %v1325_v35 }
  0xe3   :  { %v1922_v38 = vmax.f32 %v1484_v32, 0.0  ;;  %v1986_v39 = vmax.f32 %v1644_v33, 0.0 }
  0xe4   :  { %v1795_v40 = vmax.f32 %v1166_v36, 0.0  ;;  %v1859_v41 = vmax.f32 %v1326_v37, 0.0 }
  0xe5   :  { %v2197_v42 = vadd.f32 %v2196_v26, %v1922_v38  ;;  %v2271_v43 = vadd.f32 %v2270_v27, %v1986_v39  ;;  %v3018_v27 = vld [vmem:[#allocation2 + $0x268] sm:$0xff] }
  0xe6   :  { %v2050_v44 = vadd.f32 %v2049_v28, %v1795_v40  ;;  %v2124_v45 = vadd.f32 %v2123_v29, %v1859_v41  ;;  %v3050_v28 = vld [vmem:[#allocation2 + $0x368] sm:$0xff] }
  0xe8   :  { %v1485_v47 = vpop.f32.mrf.mxu2  ;;  %v1645_v48 = vpop.f32.mrf.mxu3 }
  0xe9   :  { %v1486_v51 = vadd.f32 %v3225_v46, %v1485_v47  ;;  %v1646_v52 = vadd.f32 %v3225_v46, %v1645_v48  ;;  %v1168_v53 = vpop.f32.mrf.mxu0  ;;  %v1328_v54 = vpop.f32.mrf.mxu1 }
  0xea   :  { %v1169_v57 = vadd.f32 %v3225_v46, %v1168_v53  ;;  %v1329_v58 = vadd.f32 %v3225_v46, %v1328_v54 }
  0xeb   :  { %v1923_v59 = vmax.f32 %v1486_v51, 0.0  ;;  %v1987_v60 = vmax.f32 %v1646_v52, 0.0 }
  0xec   :  { %v1796_v61 = vmax.f32 %v1169_v57, 0.0  ;;  %v1860_v62 = vmax.f32 %v1329_v58, 0.0  ;;  %1207 = vmatmul.bf16.gmra.mxu0 %v2953_v49  ;;  %1367 = vmatmul.bf16.gmra.mxu1 %v2985_v50  ;;  %v2955_v58 = vld [vmem:[#allocation2 + $0x70] sm:$0xff] }
  0xed   :  { %v2198_v63 = vadd.f32 %v2197_v42, %v1923_v59  ;;  %v2272_v0 = vadd.f32 %v2271_v43, %v1987_v60  ;;  %1527 = vmatmul.bf16.gmra.mxu2 %v3017_v55  ;;  %1687 = vmatmul.bf16.gmra.mxu3 %v3049_v56  ;;  %v2987_v59 = vld [vmem:[#allocation2 + $0x170] sm:$0xff] }
  0xee   :  { %v2051_v1 = vadd.f32 %v2050_v44, %v1796_v61  ;;  %v2125_v2 = vadd.f32 %v2124_v45, %v1860_v62 }
  0xf0   :  { %v1488_v3 = vpop.f32.mrf.mxu2  ;;  %v1648_v4 = vpop.f32.mrf.mxu3 }
  0xf1   :  { %v1489_v5 = vadd.f32 %v3225_v46, %v1488_v3  ;;  %v1649_v6 = vadd.f32 %v3225_v46, %v1648_v4  ;;  %v1170_v7 = vpop.f32.mrf.mxu0  ;;  %v1330_v8 = vpop.f32.mrf.mxu1 }
  0xf2   :  { %v1171_v9 = vadd.f32 %v3225_v46, %v1170_v7  ;;  %v1331_v10 = vadd.f32 %v3225_v46, %v1330_v8 }
  0xf3   :  { %v1924_v11 = vmax.f32 %v1489_v5, 0.0  ;;  %v1988_v12 = vmax.f32 %v1649_v6, 0.0 }
  0xf4   :  { %v1797_v13 = vmax.f32 %v1171_v9, 0.0  ;;  %v1861_v14 = vmax.f32 %v1331_v10, 0.0 }
  0xf5   :  { %v2199_v15 = vadd.f32 %v2198_v63, %v1924_v11  ;;  %v2273_v16 = vadd.f32 %v2272_v0, %v1988_v12  ;;  %v3019_v0 = vld [vmem:[#allocation2 + $0x270] sm:$0xff] }
  0xf6   :  { %v2052_v17 = vadd.f32 %v2051_v1, %v1797_v13  ;;  %v2126_v18 = vadd.f32 %v2125_v2, %v1861_v14  ;;  %v3051_v1 = vld [vmem:[#allocation2 + $0x370] sm:$0xff] }
  0xf8   :  { %v1490_v19 = vpop.f32.mrf.mxu2  ;;  %v1650_v20 = vpop.f32.mrf.mxu3 }
  0xf9   :  { %v1491_v23 = vadd.f32 %v3225_v46, %v1490_v19  ;;  %v1651_v24 = vadd.f32 %v3225_v46, %v1650_v20  ;;  %v1173_v25 = vpop.f32.mrf.mxu0  ;;  %v1333_v26 = vpop.f32.mrf.mxu1 }
  0xfa   :  { %v1174_v29 = vadd.f32 %v3225_v46, %v1173_v25  ;;  %v1334_v30 = vadd.f32 %v3225_v46, %v1333_v26 }
  0xfb   :  { %v1925_v31 = vmax.f32 %v1491_v23, 0.0  ;;  %v1989_v32 = vmax.f32 %v1651_v24, 0.0 }
  0xfc   :  { %v1798_v33 = vmax.f32 %v1174_v29, 0.0  ;;  %v1862_v34 = vmax.f32 %v1334_v30, 0.0  ;;  %1212 = vmatmul.bf16.gmra.mxu0 %v2954_v21  ;;  %1372 = vmatmul.bf16.gmra.mxu1 %v2986_v22  ;;  %v2956_v30 = vld [vmem:[#allocation2 + $0x78] sm:$0xff] }
  0xfd   :  { %v2200_v35 = vadd.f32 %v2199_v15, %v1925_v31  ;;  %v2274_v36 = vadd.f32 %v2273_v16, %v1989_v32  ;;  %1532 = vmatmul.bf16.gmra.mxu2 %v3018_v27  ;;  %1692 = vmatmul.bf16.gmra.mxu3 %v3050_v28  ;;  %v2988_v31 = vld [vmem:[#allocation2 + $0x178] sm:$0xff] }
  0xfe   :  { %v2053_v37 = vadd.f32 %v2052_v17, %v1798_v33  ;;  %v2127_v38 = vadd.f32 %v2126_v18, %v1862_v34 }
 0x100   :  { %v1493_v39 = vpop.f32.mrf.mxu2  ;;  %v1653_v40 = vpop.f32.mrf.mxu3 }
 0x101   :  { %v1494_v41 = vadd.f32 %v3225_v46, %v1493_v39  ;;  %v1654_v42 = vadd.f32 %v3225_v46, %v1653_v40  ;;  %v1175_v43 = vpop.f32.mrf.mxu0  ;;  %v1335_v44 = vpop.f32.mrf.mxu1 }
 0x102   :  { %v1176_v45 = vadd.f32 %v3225_v46, %v1175_v43  ;;  %v1336_v47 = vadd.f32 %v3225_v46, %v1335_v44 }
 0x103   :  { %v1926_v48 = vmax.f32 %v1494_v41, 0.0  ;;  %v1990_v49 = vmax.f32 %v1654_v42, 0.0 }
 0x104   :  { %v1799_v50 = vmax.f32 %v1176_v45, 0.0  ;;  %v1863_v51 = vmax.f32 %v1336_v47, 0.0 }
 0x105   :  { %v2201_v52 = vadd.f32 %v2200_v35, %v1926_v48  ;;  %v2275_v53 = vadd.f32 %v2274_v36, %v1990_v49  ;;  %v3020_v36 = vld [vmem:[#allocation2 + $0x278] sm:$0xff] }
 0x106   :  { %v2054_v54 = vadd.f32 %v2053_v37, %v1799_v50  ;;  %v2128_v55 = vadd.f32 %v2127_v38, %v1863_v51  ;;  %v3052_v37 = vld [vmem:[#allocation2 + $0x378] sm:$0xff] }
 0x108   :  { %v1495_v56 = vpop.f32.mrf.mxu2  ;;  %v1655_v57 = vpop.f32.mrf.mxu3 }
 0x109   :  { %v1496_v60 = vadd.f32 %v3225_v46, %v1495_v56  ;;  %v1656_v61 = vadd.f32 %v3225_v46, %v1655_v57  ;;  %v1178_v62 = vpop.f32.mrf.mxu0  ;;  %v1338_v63 = vpop.f32.mrf.mxu1 }
 0x10a   :  { %v1179_v2 = vadd.f32 %v3225_v46, %v1178_v62  ;;  %v1339_v3 = vadd.f32 %v3225_v46, %v1338_v63 }
 0x10b   :  { %v1927_v4 = vmax.f32 %v1496_v60, 0.0  ;;  %v1991_v5 = vmax.f32 %v1656_v61, 0.0 }
 0x10c   :  { %v1800_v6 = vmax.f32 %v1179_v2, 0.0  ;;  %v1864_v7 = vmax.f32 %v1339_v3, 0.0  ;;  %1217 = vmatmul.bf16.gmra.mxu0 %v2955_v58  ;;  %1377 = vmatmul.bf16.gmra.mxu1 %v2987_v59  ;;  %v2957_v3 = vld [vmem:[#allocation2 + $0x80] sm:$0xff] }
 0x10d   :  { %v2202_v8 = vadd.f32 %v2201_v52, %v1927_v4  ;;  %v2276_v9 = vadd.f32 %v2275_v53, %v1991_v5  ;;  %1537 = vmatmul.bf16.gmra.mxu2 %v3019_v0  ;;  %1697 = vmatmul.bf16.gmra.mxu3 %v3051_v1  ;;  %v2989_v4 = vld [vmem:[#allocation2 + $0x180] sm:$0xff] }
 0x10e   :  { %v2055_v10 = vadd.f32 %v2054_v54, %v1800_v6  ;;  %v2129_v11 = vadd.f32 %v2128_v55, %v1864_v7 }
 0x110   :  { %v1498_v12 = vpop.f32.mrf.mxu2  ;;  %v1658_v13 = vpop.f32.mrf.mxu3 }
 0x111   :  { %v1499_v14 = vadd.f32 %v3225_v46, %v1498_v12  ;;  %v1659_v15 = vadd.f32 %v3225_v46, %v1658_v13  ;;  %v1180_v16 = vpop.f32.mrf.mxu0  ;;  %v1340_v17 = vpop.f32.mrf.mxu1 }
 0x112   :  { %v1181_v18 = vadd.f32 %v3225_v46, %v1180_v16  ;;  %v1341_v19 = vadd.f32 %v3225_v46, %v1340_v17 }
 0x113   :  { %v1928_v20 = vmax.f32 %v1499_v14, 0.0  ;;  %v1992_v21 = vmax.f32 %v1659_v15, 0.0 }
 0x114   :  { %v1801_v22 = vmax.f32 %v1181_v18, 0.0  ;;  %v1865_v23 = vmax.f32 %v1341_v19, 0.0 }
 0x115   :  { %v2203_v24 = vadd.f32 %v2202_v8, %v1928_v20  ;;  %v2277_v25 = vadd.f32 %v2276_v9, %v1992_v21  ;;  %v3021_v9 = vld [vmem:[#allocation2 + $0x280] sm:$0xff] }
 0x116   :  { %v2056_v26 = vadd.f32 %v2055_v10, %v1801_v22  ;;  %v2130_v27 = vadd.f32 %v2129_v11, %v1865_v23  ;;  %v3053_v10 = vld [vmem:[#allocation2 + $0x380] sm:$0xff] }
 0x118   :  { %v1500_v28 = vpop.f32.mrf.mxu2  ;;  %v1660_v29 = vpop.f32.mrf.mxu3 }
 0x119   :  { %v1501_v32 = vadd.f32 %v3225_v46, %v1500_v28  ;;  %v1661_v33 = vadd.f32 %v3225_v46, %v1660_v29  ;;  %v1183_v34 = vpop.f32.mrf.mxu0  ;;  %v1343_v35 = vpop.f32.mrf.mxu1 }
 0x11a   :  { %v1184_v38 = vadd.f32 %v3225_v46, %v1183_v34  ;;  %v1344_v39 = vadd.f32 %v3225_v46, %v1343_v35 }
 0x11b   :  { %v1929_v40 = vmax.f32 %v1501_v32, 0.0  ;;  %v1993_v41 = vmax.f32 %v1661_v33, 0.0 }
 0x11c   :  { %v1802_v42 = vmax.f32 %v1184_v38, 0.0  ;;  %v1866_v43 = vmax.f32 %v1344_v39, 0.0  ;;  %1222 = vmatmul.bf16.gmra.mxu0 %v2956_v30  ;;  %1382 = vmatmul.bf16.gmra.mxu1 %v2988_v31  ;;  %v2958_v39 = vld [vmem:[#allocation2 + $0x88] sm:$0xff] }
 0x11d   :  { %v2204_v44 = vadd.f32 %v2203_v24, %v1929_v40  ;;  %v2278_v45 = vadd.f32 %v2277_v25, %v1993_v41  ;;  %1542 = vmatmul.bf16.gmra.mxu2 %v3020_v36  ;;  %1702 = vmatmul.bf16.gmra.mxu3 %v3052_v37  ;;  %v2990_v40 = vld [vmem:[#allocation2 + $0x188] sm:$0xff] }
 0x11e   :  { %v2057_v47 = vadd.f32 %v2056_v26, %v1802_v42  ;;  %v2131_v48 = vadd.f32 %v2130_v27, %v1866_v43 }
 0x120   :  { %v1503_v49 = vpop.f32.mrf.mxu2  ;;  %v1663_v50 = vpop.f32.mrf.mxu3 }
 0x121   :  { %v1504_v51 = vadd.f32 %v3225_v46, %v1503_v49  ;;  %v1664_v52 = vadd.f32 %v3225_v46, %v1663_v50  ;;  %v1185_v53 = vpop.f32.mrf.mxu0  ;;  %v1345_v54 = vpop.f32.mrf.mxu1 }
 0x122   :  { %v1186_v55 = vadd.f32 %v3225_v46, %v1185_v53  ;;  %v1346_v56 = vadd.f32 %v3225_v46, %v1345_v54 }
 0x123   :  { %v1930_v57 = vmax.f32 %v1504_v51, 0.0  ;;  %v1994_v58 = vmax.f32 %v1664_v52, 0.0 }
 0x124   :  { %v1803_v59 = vmax.f32 %v1186_v55, 0.0  ;;  %v1867_v60 = vmax.f32 %v1346_v56, 0.0 }
 0x125   :  { %v2205_v61 = vadd.f32 %v2204_v44, %v1930_v57  ;;  %v2279_v62 = vadd.f32 %v2278_v45, %v1994_v58  ;;  %v3022_v45 = vld [vmem:[#allocation2 + $0x288] sm:$0xff] }
 0x126   :  { %v2058_v63 = vadd.f32 %v2057_v47, %v1803_v59  ;;  %v2132_v0 = vadd.f32 %v2131_v48, %v1867_v60  ;;  %v3054_v47 = vld [vmem:[#allocation2 + $0x388] sm:$0xff] }
 0x128   :  { %v1505_v1 = vpop.f32.mrf.mxu2  ;;  %v1665_v2 = vpop.f32.mrf.mxu3 }
 0x129   :  { %v1506_v5 = vadd.f32 %v3225_v46, %v1505_v1  ;;  %v1666_v6 = vadd.f32 %v3225_v46, %v1665_v2  ;;  %v1188_v7 = vpop.f32.mrf.mxu0  ;;  %v1348_v8 = vpop.f32.mrf.mxu1 }
 0x12a   :  { %v1189_v11 = vadd.f32 %v3225_v46, %v1188_v7  ;;  %v1349_v12 = vadd.f32 %v3225_v46, %v1348_v8 }
 0x12b   :  { %v1931_v13 = vmax.f32 %v1506_v5, 0.0  ;;  %v1995_v14 = vmax.f32 %v1666_v6, 0.0 }
 0x12c   :  { %v1804_v15 = vmax.f32 %v1189_v11, 0.0  ;;  %v1868_v16 = vmax.f32 %v1349_v12, 0.0  ;;  %1227 = vmatmul.bf16.gmra.mxu0 %v2957_v3  ;;  %1387 = vmatmul.bf16.gmra.mxu1 %v2989_v4  ;;  %v2959_v12 = vld [vmem:[#allocation2 + $0x90] sm:$0xff] }
 0x12d   :  { %v2206_v17 = vadd.f32 %v2205_v61, %v1931_v13  ;;  %v2280_v18 = vadd.f32 %v2279_v62, %v1995_v14  ;;  %1547 = vmatmul.bf16.gmra.mxu2 %v3021_v9  ;;  %1707 = vmatmul.bf16.gmra.mxu3 %v3053_v10  ;;  %v2991_v13 = vld [vmem:[#allocation2 + $0x190] sm:$0xff] }
 0x12e   :  { %v2059_v19 = vadd.f32 %v2058_v63, %v1804_v15  ;;  %v2133_v20 = vadd.f32 %v2132_v0, %v1868_v16 }
 0x130   :  { %v1508_v21 = vpop.f32.mrf.mxu2  ;;  %v1668_v22 = vpop.f32.mrf.mxu3 }
 0x131   :  { %v1509_v23 = vadd.f32 %v3225_v46, %v1508_v21  ;;  %v1669_v24 = vadd.f32 %v3225_v46, %v1668_v22  ;;  %v1190_v25 = vpop.f32.mrf.mxu0  ;;  %v1350_v26 = vpop.f32.mrf.mxu1 }
 0x132   :  { %v1191_v27 = vadd.f32 %v3225_v46, %v1190_v25  ;;  %v1351_v28 = vadd.f32 %v3225_v46, %v1350_v26 }
 0x133   :  { %v1932_v29 = vmax.f32 %v1509_v23, 0.0  ;;  %v1996_v30 = vmax.f32 %v1669_v24, 0.0 }
 0x134   :  { %v1805_v31 = vmax.f32 %v1191_v27, 0.0  ;;  %v1869_v32 = vmax.f32 %v1351_v28, 0.0 }
 0x135   :  { %v2207_v33 = vadd.f32 %v2206_v17, %v1932_v29  ;;  %v2281_v34 = vadd.f32 %v2280_v18, %v1996_v30  ;;  %v3023_v18 = vld [vmem:[#allocation2 + $0x290] sm:$0xff] }
 0x136   :  { %v2060_v35 = vadd.f32 %v2059_v19, %v1805_v31  ;;  %v2134_v36 = vadd.f32 %v2133_v20, %v1869_v32  ;;  %v3055_v19 = vld [vmem:[#allocation2 + $0x390] sm:$0xff] }
 0x138   :  { %v1510_v37 = vpop.f32.mrf.mxu2  ;;  %v1670_v38 = vpop.f32.mrf.mxu3 }
 0x139   :  { %v1511_v41 = vadd.f32 %v3225_v46, %v1510_v37  ;;  %v1671_v42 = vadd.f32 %v3225_v46, %v1670_v38  ;;  %v1193_v43 = vpop.f32.mrf.mxu0  ;;  %v1353_v44 = vpop.f32.mrf.mxu1 }
 0x13a   :  { %v1194_v48 = vadd.f32 %v3225_v46, %v1193_v43  ;;  %v1354_v49 = vadd.f32 %v3225_v46, %v1353_v44 }
 0x13b   :  { %v1933_v50 = vmax.f32 %v1511_v41, 0.0  ;;  %v1997_v51 = vmax.f32 %v1671_v42, 0.0 }
 0x13c   :  { %v1806_v52 = vmax.f32 %v1194_v48, 0.0  ;;  %v1870_v53 = vmax.f32 %v1354_v49, 0.0  ;;  %1232 = vmatmul.bf16.gmra.mxu0 %v2958_v39  ;;  %1392 = vmatmul.bf16.gmra.mxu1 %v2990_v40  ;;  %v2960_v49 = vld [vmem:[#allocation2 + $0x98] sm:$0xff] }
 0x13d   :  { %v2208_v54 = vadd.f32 %v2207_v33, %v1933_v50  ;;  %v2282_v55 = vadd.f32 %v2281_v34, %v1997_v51  ;;  %1552 = vmatmul.bf16.gmra.mxu2 %v3022_v45  ;;  %1712 = vmatmul.bf16.gmra.mxu3 %v3054_v47  ;;  %v2992_v50 = vld [vmem:[#allocation2 + $0x198] sm:$0xff] }
 0x13e   :  { %v2061_v56 = vadd.f32 %v2060_v35, %v1806_v52  ;;  %v2135_v57 = vadd.f32 %v2134_v36, %v1870_v53 }
 0x140   :  { %v1513_v58 = vpop.f32.mrf.mxu2  ;;  %v1673_v59 = vpop.f32.mrf.mxu3 }
 0x141   :  { %v1514_v60 = vadd.f32 %v3225_v46, %v1513_v58  ;;  %v1674_v61 = vadd.f32 %v3225_v46, %v1673_v59  ;;  %v1195_v62 = vpop.f32.mrf.mxu0  ;;  %v1355_v63 = vpop.f32.mrf.mxu1 }
 0x142   :  { %v1196_v0 = vadd.f32 %v3225_v46, %v1195_v62  ;;  %v1356_v1 = vadd.f32 %v3225_v46, %v1355_v63 }
 0x143   :  { %v1934_v2 = vmax.f32 %v1514_v60, 0.0  ;;  %v1998_v3 = vmax.f32 %v1674_v61, 0.0 }
 0x144   :  { %v1807_v4 = vmax.f32 %v1196_v0, 0.0  ;;  %v1871_v5 = vmax.f32 %v1356_v1, 0.0 }
 0x145   :  { %v2209_v6 = vadd.f32 %v2208_v54, %v1934_v2  ;;  %v2283_v7 = vadd.f32 %v2282_v55, %v1998_v3  ;;  %v3024_v55 = vld [vmem:[#allocation2 + $0x298] sm:$0xff] }
 0x146   :  { %v2062_v8 = vadd.f32 %v2061_v56, %v1807_v4  ;;  %v2136_v9 = vadd.f32 %v2135_v57, %v1871_v5  ;;  %v3056_v56 = vld [vmem:[#allocation2 + $0x398] sm:$0xff] }
 0x148   :  { %v1515_v10 = vpop.f32.mrf.mxu2  ;;  %v1675_v11 = vpop.f32.mrf.mxu3 }
 0x149   :  { %v1516_v14 = vadd.f32 %v3225_v46, %v1515_v10  ;;  %v1676_v15 = vadd.f32 %v3225_v46, %v1675_v11  ;;  %v1198_v16 = vpop.f32.mrf.mxu0  ;;  %v1358_v17 = vpop.f32.mrf.mxu1 }
 0x14a   :  { %v1199_v20 = vadd.f32 %v3225_v46, %v1198_v16  ;;  %v1359_v21 = vadd.f32 %v3225_v46, %v1358_v17 }
 0x14b   :  { %v1935_v22 = vmax.f32 %v1516_v14, 0.0  ;;  %v1999_v23 = vmax.f32 %v1676_v15, 0.0 }
 0x14c   :  { %v1808_v24 = vmax.f32 %v1199_v20, 0.0  ;;  %v1872_v25 = vmax.f32 %v1359_v21, 0.0  ;;  %1237 = vmatmul.bf16.gmra.mxu0 %v2959_v12  ;;  %1397 = vmatmul.bf16.gmra.mxu1 %v2991_v13  ;;  %v2961_v21 = vld [vmem:[#allocation2 + $0xa0] sm:$0xff] }
 0x14d   :  { %v2210_v26 = vadd.f32 %v2209_v6, %v1935_v22  ;;  %v2284_v27 = vadd.f32 %v2283_v7, %v1999_v23  ;;  %1557 = vmatmul.bf16.gmra.mxu2 %v3023_v18  ;;  %1717 = vmatmul.bf16.gmra.mxu3 %v3055_v19  ;;  %v2993_v22 = vld [vmem:[#allocation2 + $0x1a0] sm:$0xff] }
 0x14e   :  { %v2063_v28 = vadd.f32 %v2062_v8, %v1808_v24  ;;  %v2137_v29 = vadd.f32 %v2136_v9, %v1872_v25 }
 0x150   :  { %v1518_v30 = vpop.f32.mrf.mxu2  ;;  %v1678_v31 = vpop.f32.mrf.mxu3 }
 0x151   :  { %v1519_v32 = vadd.f32 %v3225_v46, %v1518_v30  ;;  %v1679_v33 = vadd.f32 %v3225_v46, %v1678_v31  ;;  %v1200_v34 = vpop.f32.mrf.mxu0  ;;  %v1360_v35 = vpop.f32.mrf.mxu1 }
 0x152   :  { %v1201_v36 = vadd.f32 %v3225_v46, %v1200_v34  ;;  %v1361_v37 = vadd.f32 %v3225_v46, %v1360_v35 }
 0x153   :  { %v1936_v38 = vmax.f32 %v1519_v32, 0.0  ;;  %v2000_v39 = vmax.f32 %v1679_v33, 0.0 }
 0x154   :  { %v1809_v40 = vmax.f32 %v1201_v36, 0.0  ;;  %v1873_v41 = vmax.f32 %v1361_v37, 0.0 }
 0x155   :  { %v2211_v42 = vadd.f32 %v2210_v26, %v1936_v38  ;;  %v2285_v43 = vadd.f32 %v2284_v27, %v2000_v39  ;;  %v3025_v27 = vld [vmem:[#allocation2 + $0x2a0] sm:$0xff] }
 0x156   :  { %v2064_v44 = vadd.f32 %v2063_v28, %v1809_v40  ;;  %v2138_v45 = vadd.f32 %v2137_v29, %v1873_v41  ;;  %v3057_v28 = vld [vmem:[#allocation2 + $0x3a0] sm:$0xff] }
 0x158   :  { %v1520_v47 = vpop.f32.mrf.mxu2  ;;  %v1680_v48 = vpop.f32.mrf.mxu3 }
 0x159   :  { %v1521_v51 = vadd.f32 %v3225_v46, %v1520_v47  ;;  %v1681_v52 = vadd.f32 %v3225_v46, %v1680_v48  ;;  %v1203_v53 = vpop.f32.mrf.mxu0  ;;  %v1363_v54 = vpop.f32.mrf.mxu1 }
 0x15a   :  { %v1204_v57 = vadd.f32 %v3225_v46, %v1203_v53  ;;  %v1364_v58 = vadd.f32 %v3225_v46, %v1363_v54 }
 0x15b   :  { %v1937_v59 = vmax.f32 %v1521_v51, 0.0  ;;  %v2001_v60 = vmax.f32 %v1681_v52, 0.0 }
 0x15c   :  { %v1810_v61 = vmax.f32 %v1204_v57, 0.0  ;;  %v1874_v62 = vmax.f32 %v1364_v58, 0.0  ;;  %1242 = vmatmul.bf16.gmra.mxu0 %v2960_v49  ;;  %1402 = vmatmul.bf16.gmra.mxu1 %v2992_v50  ;;  %v2962_v58 = vld [vmem:[#allocation2 + $0xa8] sm:$0xff] }
 0x15d   :  { %v2212_v63 = vadd.f32 %v2211_v42, %v1937_v59  ;;  %v2286_v0 = vadd.f32 %v2285_v43, %v2001_v60  ;;  %1562 = vmatmul.bf16.gmra.mxu2 %v3024_v55  ;;  %1722 = vmatmul.bf16.gmra.mxu3 %v3056_v56  ;;  %v2994_v59 = vld [vmem:[#allocation2 + $0x1a8] sm:$0xff] }
 0x15e   :  { %v2065_v1 = vadd.f32 %v2064_v44, %v1810_v61  ;;  %v2139_v2 = vadd.f32 %v2138_v45, %v1874_v62 }
 0x160   :  { %v1523_v3 = vpop.f32.mrf.mxu2  ;;  %v1683_v4 = vpop.f32.mrf.mxu3 }
 0x161   :  { %v1524_v5 = vadd.f32 %v3225_v46, %v1523_v3  ;;  %v1684_v6 = vadd.f32 %v3225_v46, %v1683_v4  ;;  %v1205_v7 = vpop.f32.mrf.mxu0  ;;  %v1365_v8 = vpop.f32.mrf.mxu1 }
 0x162   :  { %v1206_v9 = vadd.f32 %v3225_v46, %v1205_v7  ;;  %v1366_v10 = vadd.f32 %v3225_v46, %v1365_v8 }
 0x163   :  { %v1938_v11 = vmax.f32 %v1524_v5, 0.0  ;;  %v2002_v12 = vmax.f32 %v1684_v6, 0.0 }
 0x164   :  { %v1811_v13 = vmax.f32 %v1206_v9, 0.0  ;;  %v1875_v14 = vmax.f32 %v1366_v10, 0.0 }
 0x165   :  { %v2213_v15 = vadd.f32 %v2212_v63, %v1938_v11  ;;  %v2287_v16 = vadd.f32 %v2286_v0, %v2002_v12  ;;  %v3026_v0 = vld [vmem:[#allocation2 + $0x2a8] sm:$0xff] }
 0x166   :  { %v2066_v17 = vadd.f32 %v2065_v1, %v1811_v13  ;;  %v2140_v18 = vadd.f32 %v2139_v2, %v1875_v14  ;;  %v3058_v1 = vld [vmem:[#allocation2 + $0x3a8] sm:$0xff]  ;;  %v3334_v2 = vld [vmem:[%s3602_s2] ss:$0 sm:$0xff] }
 0x168   :  { %v1525_v19 = vpop.f32.mrf.mxu2  ;;  %v1685_v20 = vpop.f32.mrf.mxu3 }
 0x169   :  { %v1526_v23 = vadd.f32 %v3225_v46, %v1525_v19  ;;  %v1686_v24 = vadd.f32 %v3225_v46, %v1685_v20  ;;  %v1208_v25 = vpop.f32.mrf.mxu0  ;;  %v1368_v26 = vpop.f32.mrf.mxu1 }
 0x16a   :  { %v1209_v29 = vadd.f32 %v3225_v46, %v1208_v25  ;;  %v1369_v30 = vadd.f32 %v3225_v46, %v1368_v26 }
 0x16b   :  { %v1939_v31 = vmax.f32 %v1526_v23, 0.0  ;;  %v2003_v32 = vmax.f32 %v1686_v24, 0.0 }
 0x16c   :  { %v1812_v33 = vmax.f32 %v1209_v29, 0.0  ;;  %v1876_v34 = vmax.f32 %v1369_v30, 0.0  ;;  %1247 = vmatmul.bf16.gmra.mxu0 %v2961_v21  ;;  %1407 = vmatmul.bf16.gmra.mxu1 %v2993_v22  ;;  %v2963_v30 = vld [vmem:[#allocation2 + $0xb0] sm:$0xff] }
 0x16d   :  { %v2214_v35 = vadd.f32 %v2213_v15, %v1939_v31  ;;  %v2288_v36 = vadd.f32 %v2287_v16, %v2003_v32  ;;  %1567 = vmatmul.bf16.gmra.mxu2 %v3025_v27  ;;  %1727 = vmatmul.bf16.gmra.mxu3 %v3057_v28  ;;  %v2995_v31 = vld [vmem:[#allocation2 + $0x1b0] sm:$0xff] }
 0x16e   :  { %v2067_v37 = vadd.f32 %v2066_v17, %v1812_v33  ;;  %v2141_v38 = vadd.f32 %v2140_v18, %v1876_v34 }
 0x170   :  { %v1528_v39 = vpop.f32.mrf.mxu2  ;;  %v1688_v40 = vpop.f32.mrf.mxu3 }
 0x171   :  { %v1529_v41 = vadd.f32 %v3225_v46, %v1528_v39  ;;  %v1689_v42 = vadd.f32 %v3225_v46, %v1688_v40  ;;  %v1210_v43 = vpop.f32.mrf.mxu0  ;;  %v1370_v44 = vpop.f32.mrf.mxu1 }
 0x172   :  { %v1211_v45 = vadd.f32 %v3225_v46, %v1210_v43  ;;  %v1371_v47 = vadd.f32 %v3225_v46, %v1370_v44 }
 0x173   :  { %v1940_v48 = vmax.f32 %v1529_v41, 0.0  ;;  %v2004_v49 = vmax.f32 %v1689_v42, 0.0 }
 0x174   :  { %v1813_v50 = vmax.f32 %v1211_v45, 0.0  ;;  %v1877_v51 = vmax.f32 %v1371_v47, 0.0 }
 0x175   :  { %v2215_v52 = vadd.f32 %v2214_v35, %v1940_v48  ;;  %v2289_v53 = vadd.f32 %v2288_v36, %v2004_v49  ;;  %v3027_v36 = vld [vmem:[#allocation2 + $0x2b0] sm:$0xff] }
 0x176   :  { %v2068_v54 = vadd.f32 %v2067_v37, %v1813_v50  ;;  %v2142_v55 = vadd.f32 %v2141_v38, %v1877_v51  ;;  %v3059_v37 = vld [vmem:[#allocation2 + $0x3b0] sm:$0xff] }
 0x178   :  { %v1530_v56 = vpop.f32.mrf.mxu2  ;;  %v1690_v57 = vpop.f32.mrf.mxu3 }
 0x179   :  { %v1531_v60 = vadd.f32 %v3225_v46, %v1530_v56  ;;  %v1691_v61 = vadd.f32 %v3225_v46, %v1690_v57  ;;  %v1213_v62 = vpop.f32.mrf.mxu0  ;;  %v1373_v63 = vpop.f32.mrf.mxu1 }
 0x17a   :  { %v1214_v3 = vadd.f32 %v3334_v2, %v1213_v62  ;;  %v1374_v4 = vadd.f32 %v3334_v2, %v1373_v63 }
 0x17b   :  { %v1941_v5 = vmax.f32 %v1531_v60, 0.0  ;;  %v2005_v6 = vmax.f32 %v1691_v61, 0.0 }
 0x17c   :  { %v1814_v7 = vmax.f32 %v1214_v3, 0.0  ;;  %v1878_v8 = vmax.f32 %v1374_v4, 0.0  ;;  %1252 = vmatmul.bf16.gmra.mxu0 %v2962_v58  ;;  %1412 = vmatmul.bf16.gmra.mxu1 %v2994_v59  ;;  %v2964_v4 = vld [vmem:[#allocation2 + $0xb8] sm:$0xff] }
 0x17d   :  { %v2216_v46 = vadd.f32 %v2215_v52, %v1941_v5  ;;  %v2290_v9 = vadd.f32 %v2289_v53, %v2005_v6  ;;  %1572 = vmatmul.bf16.gmra.mxu2 %v3026_v0  ;;  %1732 = vmatmul.bf16.gmra.mxu3 %v3058_v1  ;;  %v2996_v5 = vld [vmem:[#allocation2 + $0x1b8] sm:$0xff] }
 0x17e   :  { %v2069_v10 = vadd.f32 %v2068_v54, %v1814_v7  ;;  %v2143_v11 = vadd.f32 %v2142_v55, %v1878_v8 }
 0x180   :  { %v1533_v12 = vpop.f32.mrf.mxu2  ;;  %v1693_v13 = vpop.f32.mrf.mxu3 }
 0x181   :  { %v1534_v14 = vadd.f32 %v3334_v2, %v1533_v12  ;;  %v1694_v15 = vadd.f32 %v3334_v2, %v1693_v13  ;;  %v1215_v16 = vpop.f32.mrf.mxu0  ;;  %v1375_v17 = vpop.f32.mrf.mxu1 }
 0x182   :  { %v1216_v18 = vadd.f32 %v3334_v2, %v1215_v16  ;;  %v1376_v19 = vadd.f32 %v3334_v2, %v1375_v17 }
 0x183   :  { %v1942_v20 = vmax.f32 %v1534_v14, 0.0  ;;  %v2006_v21 = vmax.f32 %v1694_v15, 0.0 }
 0x184   :  { %v1815_v22 = vmax.f32 %v1216_v18, 0.0  ;;  %v1879_v23 = vmax.f32 %v1376_v19, 0.0 }
 0x185   :  { %v2217_v24 = vadd.f32 %v2216_v46, %v1942_v20  ;;  %v2291_v25 = vadd.f32 %v2290_v9, %v2006_v21  ;;  %v3028_v9 = vld [vmem:[#allocation2 + $0x2b8] sm:$0xff] }
 0x186   :  { %v2070_v26 = vadd.f32 %v2069_v10, %v1815_v22  ;;  %v2144_v27 = vadd.f32 %v2143_v11, %v1879_v23  ;;  %v3060_v10 = vld [vmem:[#allocation2 + $0x3b8] sm:$0xff] }
 0x188   :  { %v1535_v28 = vpop.f32.mrf.mxu2  ;;  %v1695_v29 = vpop.f32.mrf.mxu3 }
 0x189   :  { %v1536_v32 = vadd.f32 %v3334_v2, %v1535_v28  ;;  %v1696_v33 = vadd.f32 %v3334_v2, %v1695_v29  ;;  %v1218_v34 = vpop.f32.mrf.mxu0  ;;  %v1378_v35 = vpop.f32.mrf.mxu1 }
 0x18a   :  { %v1219_v38 = vadd.f32 %v3334_v2, %v1218_v34  ;;  %v1379_v39 = vadd.f32 %v3334_v2, %v1378_v35 }
 0x18b   :  { %v1943_v40 = vmax.f32 %v1536_v32, 0.0  ;;  %v2007_v41 = vmax.f32 %v1696_v33, 0.0 }
 0x18c   :  { %v1816_v42 = vmax.f32 %v1219_v38, 0.0  ;;  %v1880_v43 = vmax.f32 %v1379_v39, 0.0  ;;  %1257 = vmatmul.bf16.gmra.mxu0 %v2963_v30  ;;  %1417 = vmatmul.bf16.gmra.mxu1 %v2995_v31  ;;  %v2965_v39 = vld [vmem:[#allocation2 + $0xc0] sm:$0xff] }
 0x18d   :  { %v2218_v44 = vadd.f32 %v2217_v24, %v1943_v40  ;;  %v2292_v45 = vadd.f32 %v2291_v25, %v2007_v41  ;;  %1577 = vmatmul.bf16.gmra.mxu2 %v3027_v36  ;;  %1737 = vmatmul.bf16.gmra.mxu3 %v3059_v37  ;;  %v2997_v40 = vld [vmem:[#allocation2 + $0x1c0] sm:$0xff] }
 0x18e   :  { %v2071_v47 = vadd.f32 %v2070_v26, %v1816_v42  ;;  %v2145_v48 = vadd.f32 %v2144_v27, %v1880_v43 }
 0x190   :  { %v1538_v49 = vpop.f32.mrf.mxu2  ;;  %v1698_v50 = vpop.f32.mrf.mxu3 }
 0x191   :  { %v1539_v51 = vadd.f32 %v3334_v2, %v1538_v49  ;;  %v1699_v52 = vadd.f32 %v3334_v2, %v1698_v50  ;;  %v1220_v53 = vpop.f32.mrf.mxu0  ;;  %v1380_v54 = vpop.f32.mrf.mxu1 }
 0x192   :  { %v1221_v55 = vadd.f32 %v3334_v2, %v1220_v53  ;;  %v1381_v56 = vadd.f32 %v3334_v2, %v1380_v54 }
 0x193   :  { %v1944_v57 = vmax.f32 %v1539_v51, 0.0  ;;  %v2008_v58 = vmax.f32 %v1699_v52, 0.0 }
 0x194   :  { %v1817_v59 = vmax.f32 %v1221_v55, 0.0  ;;  %v1881_v60 = vmax.f32 %v1381_v56, 0.0 }
 0x195   :  { %v2219_v61 = vadd.f32 %v2218_v44, %v1944_v57  ;;  %v2293_v62 = vadd.f32 %v2292_v45, %v2008_v58  ;;  %v3029_v45 = vld [vmem:[#allocation2 + $0x2c0] sm:$0xff] }
 0x196   :  { %v2072_v63 = vadd.f32 %v2071_v47, %v1817_v59  ;;  %v2146_v0 = vadd.f32 %v2145_v48, %v1881_v60  ;;  %v3061_v47 = vld [vmem:[#allocation2 + $0x3c0] sm:$0xff] }
 0x198   :  { %v1540_v1 = vpop.f32.mrf.mxu2  ;;  %v1700_v3 = vpop.f32.mrf.mxu3 }
 0x199   :  { %v1541_v6 = vadd.f32 %v3334_v2, %v1540_v1  ;;  %v1701_v7 = vadd.f32 %v3334_v2, %v1700_v3  ;;  %v1223_v8 = vpop.f32.mrf.mxu0  ;;  %v1383_v46 = vpop.f32.mrf.mxu1 }
 0x19a   :  { %v1224_v11 = vadd.f32 %v3334_v2, %v1223_v8  ;;  %v1384_v12 = vadd.f32 %v3334_v2, %v1383_v46  ;;  %v2998_v8 = vld [vmem:[#allocation2 + $0x1c8] sm:$0xff] }
 0x19b   :  { %v1945_v13 = vmax.f32 %v1541_v6, 0.0  ;;  %v2009_v14 = vmax.f32 %v1701_v7, 0.0  ;;  %v2966_v7 = vld [vmem:[#allocation2 + $0xc8] sm:$0xff] }
 0x19c   :  { %v1818_v15 = vmax.f32 %v1224_v11, 0.0  ;;  %v1882_v16 = vmax.f32 %v1384_v12, 0.0  ;;  %1262 = vmatmul.bf16.gmra.mxu0 %v2964_v4  ;;  %1422 = vmatmul.bf16.gmra.mxu1 %v2996_v5  ;;  %v3030_v12 = vld [vmem:[#allocation2 + $0x2c8] sm:$0xff] }
 0x19d   :  { %v2220_v17 = vadd.f32 %v2219_v61, %v1945_v13  ;;  %v2294_v18 = vadd.f32 %v2293_v62, %v2009_v14  ;;  %1582 = vmatmul.bf16.gmra.mxu2 %v3028_v9  ;;  %1742 = vmatmul.bf16.gmra.mxu3 %v3060_v10  ;;  %v3062_v13 = vld [vmem:[#allocation2 + $0x3c8] sm:$0xff] }
 0x19e   :  { %v2073_v19 = vadd.f32 %v2072_v63, %v1818_v15  ;;  %v2147_v20 = vadd.f32 %v2146_v0, %v1882_v16 }
 0x1a0   :  { %v1543_v21 = vpop.f32.mrf.mxu2  ;;  %v1703_v22 = vpop.f32.mrf.mxu3 }
 0x1a1   :  { %v1544_v23 = vadd.f32 %v3334_v2, %v1543_v21  ;;  %v1704_v24 = vadd.f32 %v3334_v2, %v1703_v22  ;;  %v1225_v25 = vpop.f32.mrf.mxu0  ;;  %v1385_v26 = vpop.f32.mrf.mxu1 }
 0x1a2   :  { %v1226_v27 = vadd.f32 %v3334_v2, %v1225_v25  ;;  %v1386_v28 = vadd.f32 %v3334_v2, %v1385_v26 }
 0x1a3   :  { %v1946_v29 = vmax.f32 %v1544_v23, 0.0  ;;  %v2010_v30 = vmax.f32 %v1704_v24, 0.0 }
 0x1a4   :  { %v1819_v31 = vmax.f32 %v1226_v27, 0.0  ;;  %v1883_v32 = vmax.f32 %v1386_v28, 0.0 }
 0x1a5   :  { %v2221_v33 = vadd.f32 %v2220_v17, %v1946_v29  ;;  %v2295_v34 = vadd.f32 %v2294_v18, %v2010_v30 }
 0x1a6   :  { %v3358_v35 = vadd.f32 %v2073_v19, %v1819_v31  ;;  %v3360_v36 = vadd.f32 %v2147_v20, %v1883_v32 }
 0x1a8   :  { %v1545_v37 = vpop.f32.mrf.mxu2  ;;  %v1705_v38 = vpop.f32.mrf.mxu3 }
 0x1a9   :  { %v1546_v41 = vadd.f32 %v3334_v2, %v1545_v37  ;;  %v1706_v42 = vadd.f32 %v3334_v2, %v1705_v38  ;;  %v1228_v43 = vpop.f32.mrf.mxu0  ;;  %v1388_v44 = vpop.f32.mrf.mxu1 }
 0x1aa   :  { %v1229_v52 = vadd.f32 %v3334_v2, %v1228_v43  ;;  %v1389_v53 = vadd.f32 %v3334_v2, %v1388_v44 }
 0x1ab   :  { %v1947_v48 = vmax.f32 %v1546_v41, 0.0  ;;  %v2011_v49 = vmax.f32 %v1706_v42, 0.0 }
 0x1ac   :  { %1267 = vmatmul.bf16.gmra.mxu0 %v2965_v39  ;;  %1427 = vmatmul.bf16.gmra.mxu1 %v2997_v40  ;;  %v1820_v60 = vmax.f32 %v1229_v52, 0.0  ;;  %v1884_v61 = vmax.f32 %v1389_v53, 0.0 }
 0x1ad   :  { %v3364_v50 = vadd.f32 %v2221_v33, %v1947_v48  ;;  %v3366_v51 = vadd.f32 %v2295_v34, %v2011_v49  ;;  %1587 = vmatmul.bf16.gmra.mxu2 %v3029_v45  ;;  %1747 = vmatmul.bf16.gmra.mxu3 %v3061_v47  ;;  %v2967_v47 = vld [vmem:[#allocation2 + $0xd0] sm:$0xff] }
 0x1ae   :  { %v2999_v48 = vld [vmem:[#allocation2 + $0x1d0] sm:$0xff] }
 0x1b0   :  { %v1548_v54 = vpop.f32.mrf.mxu2  ;;  %v1708_v55 = vpop.f32.mrf.mxu3 }
 0x1b1   :  { %v1230_v56 = vpop.f32.mrf.mxu0  ;;  %v1390_v57 = vpop.f32.mrf.mxu1  ;;  %v1549_v3 = vadd.f32 %v3334_v2, %v1548_v54  ;;  %v1709_v4 = vadd.f32 %v3334_v2, %v1708_v55  ;;  %v3031_v55 = vld [vmem:[#allocation2 + $0x2d0] sm:$0xff] }
 0x1b2   :  { %v1231_v58 = vadd.f32 %v3334_v2, %v1230_v56  ;;  %v1391_v59 = vadd.f32 %v3334_v2, %v1390_v57  ;;  %v3063_v56 = vld [vmem:[#allocation2 + $0x3d0] sm:$0xff] }
 0x1b3   :  { %v1948_v16 = vmax.f32 %v1549_v3, 0.0  ;;  %v2012_v17 = vmax.f32 %v1709_v4, 0.0 }
 0x1b4   :  { %v1821_v62 = vmax.f32 %v1231_v58, 0.0  ;;  %v1885_v63 = vmax.f32 %v1391_v59, 0.0 }
 0x1b6   :  { %v2081_v0 = vadd.f32 %v1821_v62, %v1820_v60  ;;  %v2155_v1 = vadd.f32 %v1885_v63, %v1884_v61 }
 0x1b8   :  { %v1550_v5 = vpop.f32.mrf.mxu2  ;;  %v1710_v6 = vpop.f32.mrf.mxu3 }
 0x1b9   :  { %v1551_v46 = vadd.f32 %v3334_v2, %v1550_v5  ;;  %v1711_v9 = vadd.f32 %v3334_v2, %v1710_v6  ;;  %v1233_v10 = vpop.f32.mrf.mxu0  ;;  %v1393_v11 = vpop.f32.mrf.mxu1 }
 0x1ba   :  { %v1234_v14 = vadd.f32 %v3334_v2, %v1233_v10  ;;  %v1394_v15 = vadd.f32 %v3334_v2, %v1393_v11 }
 0x1bb   :  { %v1949_v18 = vmax.f32 %v1551_v46, 0.0  ;;  %v2013_v19 = vmax.f32 %v1711_v9, 0.0 }
 0x1bc   :  { %v1822_v20 = vmax.f32 %v1234_v14, 0.0  ;;  %v1886_v21 = vmax.f32 %v1394_v15, 0.0  ;;  %1272 = vmatmul.bf16.gmra.mxu0 %v2966_v7  ;;  %1432 = vmatmul.bf16.gmra.mxu1 %v2998_v8 }
 0x1bd   :  { %v2229_v22 = vadd.f32 %v1949_v18, %v1948_v16  ;;  %v2303_v23 = vadd.f32 %v2013_v19, %v2012_v17  ;;  %1592 = vmatmul.bf16.gmra.mxu2 %v3030_v12  ;;  %1752 = vmatmul.bf16.gmra.mxu3 %v3062_v13 }
 0x1be   :  { %v2082_v24 = vadd.f32 %v2081_v0, %v1822_v20  ;;  %v2156_v25 = vadd.f32 %v2155_v1, %v1886_v21  ;;  %v2968_v21 = vld [vmem:[#allocation2 + $0xd8] sm:$0xff] }
 0x1c0   :  { %v1553_v26 = vpop.f32.mrf.mxu2  ;;  %v1713_v27 = vpop.f32.mrf.mxu3 }
 0x1c1   :  { %v1554_v28 = vadd.f32 %v3334_v2, %v1553_v26  ;;  %v1714_v29 = vadd.f32 %v3334_v2, %v1713_v27  ;;  %v1235_v30 = vpop.f32.mrf.mxu0  ;;  %v1395_v31 = vpop.f32.mrf.mxu1  ;;  %v3032_v27 = vld [vmem:[#allocation2 + $0x2d8] sm:$0xff] }
 0x1c2   :  { %v1236_v32 = vadd.f32 %v3334_v2, %v1235_v30  ;;  %v1396_v33 = vadd.f32 %v3334_v2, %v1395_v31 }
 0x1c3   :  { %v1950_v34 = vmax.f32 %v1554_v28, 0.0  ;;  %v2014_v37 = vmax.f32 %v1714_v29, 0.0  ;;  %v3064_v28 = vld [vmem:[#allocation2 + $0x3d8] sm:$0xff] }
 0x1c4   :  { %v1823_v38 = vmax.f32 %v1236_v32, 0.0  ;;  %v1887_v39 = vmax.f32 %v1396_v33, 0.0 }
 0x1c5   :  { %v2230_v40 = vadd.f32 %v2229_v22, %v1950_v34  ;;  %v2304_v41 = vadd.f32 %v2303_v23, %v2014_v37  ;;  %v3000_v22 = vld [vmem:[#allocation2 + $0x1d8] sm:$0xff] }
 0x1c6   :  { %v2083_v42 = vadd.f32 %v2082_v24, %v1823_v38  ;;  %v2157_v43 = vadd.f32 %v2156_v25, %v1887_v39 }
 0x1c8   :  { %v1555_v44 = vpop.f32.mrf.mxu2  ;;  %v1715_v45 = vpop.f32.mrf.mxu3 }
 0x1c9   :  { %v1556_v49 = vadd.f32 %v3334_v2, %v1555_v44  ;;  %v1716_v52 = vadd.f32 %v3334_v2, %v1715_v45  ;;  %v1238_v53 = vpop.f32.mrf.mxu0  ;;  %v1398_v54 = vpop.f32.mrf.mxu1 }
 0x1ca   :  { %v1239_v57 = vadd.f32 %v3334_v2, %v1238_v53  ;;  %v1399_v58 = vadd.f32 %v3334_v2, %v1398_v54 }
 0x1cb   :  { %v1951_v59 = vmax.f32 %v1556_v49, 0.0  ;;  %v2015_v60 = vmax.f32 %v1716_v52, 0.0 }
 0x1cc   :  { %v1824_v61 = vmax.f32 %v1239_v57, 0.0  ;;  %v1888_v62 = vmax.f32 %v1399_v58, 0.0  ;;  %1277 = vmatmul.bf16.gmra.mxu0 %v2967_v47  ;;  %1437 = vmatmul.bf16.gmra.mxu1 %v2999_v48 }
 0x1cd   :  { %v2231_v63 = vadd.f32 %v2230_v40, %v1951_v59  ;;  %v2305_v0 = vadd.f32 %v2304_v41, %v2015_v60  ;;  %1597 = vmatmul.bf16.gmra.mxu2 %v3031_v55  ;;  %1757 = vmatmul.bf16.gmra.mxu3 %v3063_v56 }
 0x1ce   :  { %v2084_v1 = vadd.f32 %v2083_v42, %v1824_v61  ;;  %v2158_v3 = vadd.f32 %v2157_v43, %v1888_v62  ;;  %v2969_v62 = vld [vmem:[#allocation2 + $0xe0] sm:$0xff] }
 0x1d0   :  { %v1558_v4 = vpop.f32.mrf.mxu2  ;;  %v1718_v5 = vpop.f32.mrf.mxu3 }
 0x1d1   :  { %v1559_v6 = vadd.f32 %v3334_v2, %v1558_v4  ;;  %v1719_v7 = vadd.f32 %v3334_v2, %v1718_v5  ;;  %v1240_v8 = vpop.f32.mrf.mxu0  ;;  %v1400_v46 = vpop.f32.mrf.mxu1  ;;  %v3033_v5 = vld [vmem:[#allocation2 + $0x2e0] sm:$0xff] }
 0x1d2   :  { %v1241_v9 = vadd.f32 %v3334_v2, %v1240_v8  ;;  %v1401_v10 = vadd.f32 %v3334_v2, %v1400_v46 }
 0x1d3   :  { %v1952_v11 = vmax.f32 %v1559_v6, 0.0  ;;  %v2016_v12 = vmax.f32 %v1719_v7, 0.0  ;;  %v3065_v6 = vld [vmem:[#allocation2 + $0x3e0] sm:$0xff] }
 0x1d4   :  { %v1825_v13 = vmax.f32 %v1241_v9, 0.0  ;;  %v1889_v14 = vmax.f32 %v1401_v10, 0.0 }
 0x1d5   :  { %v2232_v15 = vadd.f32 %v2231_v63, %v1952_v11  ;;  %v2306_v16 = vadd.f32 %v2305_v0, %v2016_v12  ;;  %v3001_v63 = vld [vmem:[#allocation2 + $0x1e0] sm:$0xff] }
 0x1d6   :  { %v2085_v17 = vadd.f32 %v2084_v1, %v1825_v13  ;;  %v2159_v18 = vadd.f32 %v2158_v3, %v1889_v14 }
 0x1d8   :  { %v1560_v19 = vpop.f32.mrf.mxu2  ;;  %v1720_v20 = vpop.f32.mrf.mxu3 }
 0x1d9   :  { %v1561_v23 = vadd.f32 %v3334_v2, %v1560_v19  ;;  %v1721_v24 = vadd.f32 %v3334_v2, %v1720_v20  ;;  %v1243_v25 = vpop.f32.mrf.mxu0  ;;  %v1403_v26 = vpop.f32.mrf.mxu1 }
 0x1da   :  { %v1244_v29 = vadd.f32 %v3334_v2, %v1243_v25  ;;  %v1404_v30 = vadd.f32 %v3334_v2, %v1403_v26 }
 0x1db   :  { %v1953_v31 = vmax.f32 %v1561_v23, 0.0  ;;  %v2017_v32 = vmax.f32 %v1721_v24, 0.0 }
 0x1dc   :  { %v1826_v33 = vmax.f32 %v1244_v29, 0.0  ;;  %v1890_v34 = vmax.f32 %v1404_v30, 0.0  ;;  %1282 = vmatmul.bf16.gmra.mxu0 %v2968_v21  ;;  %1442 = vmatmul.bf16.gmra.mxu1 %v3000_v22 }
 0x1dd   :  { %v2233_v37 = vadd.f32 %v2232_v15, %v1953_v31  ;;  %v2307_v38 = vadd.f32 %v2306_v16, %v2017_v32  ;;  %1602 = vmatmul.bf16.gmra.mxu2 %v3032_v27  ;;  %1762 = vmatmul.bf16.gmra.mxu3 %v3064_v28 }
 0x1de   :  { %v2086_v39 = vadd.f32 %v2085_v17, %v1826_v33  ;;  %v2160_v40 = vadd.f32 %v2159_v18, %v1890_v34  ;;  %v2970_v34 = vld [vmem:[#allocation2 + $0xe8] sm:$0xff] }
 0x1e0   :  { %v1563_v41 = vpop.f32.mrf.mxu2  ;;  %v1723_v42 = vpop.f32.mrf.mxu3 }
 0x1e1   :  { %v1564_v43 = vadd.f32 %v3334_v2, %v1563_v41  ;;  %v1724_v44 = vadd.f32 %v3334_v2, %v1723_v42  ;;  %v1245_v45 = vpop.f32.mrf.mxu0  ;;  %v1405_v47 = vpop.f32.mrf.mxu1  ;;  %v3034_v42 = vld [vmem:[#allocation2 + $0x2e8] sm:$0xff] }
 0x1e2   :  { %v1246_v48 = vadd.f32 %v3334_v2, %v1245_v45  ;;  %v1406_v49 = vadd.f32 %v3334_v2, %v1405_v47 }
 0x1e3   :  { %v1954_v52 = vmax.f32 %v1564_v43, 0.0  ;;  %v2018_v53 = vmax.f32 %v1724_v44, 0.0  ;;  %v3066_v43 = vld [vmem:[#allocation2 + $0x3e8] sm:$0xff] }
 0x1e4   :  { %v1827_v54 = vmax.f32 %v1246_v48, 0.0  ;;  %v1891_v55 = vmax.f32 %v1406_v49, 0.0 }
 0x1e5   :  { %v2234_v56 = vadd.f32 %v2233_v37, %v1954_v52  ;;  %v2308_v57 = vadd.f32 %v2307_v38, %v2018_v53  ;;  %v3002_v37 = vld [vmem:[#allocation2 + $0x1e8] sm:$0xff] }
 0x1e6   :  { %v2087_v58 = vadd.f32 %v2086_v39, %v1827_v54  ;;  %v2161_v59 = vadd.f32 %v2160_v40, %v1891_v55 }
 0x1e8   :  { %v1565_v60 = vpop.f32.mrf.mxu2  ;;  %v1725_v61 = vpop.f32.mrf.mxu3 }
 0x1e9   :  { %v1566_v0 = vadd.f32 %v3334_v2, %v1565_v60  ;;  %v1726_v1 = vadd.f32 %v3334_v2, %v1725_v61  ;;  %v1248_v3 = vpop.f32.mrf.mxu0  ;;  %v1408_v4 = vpop.f32.mrf.mxu1 }
 0x1ea   :  { %v1249_v7 = vadd.f32 %v3334_v2, %v1248_v3  ;;  %v1409_v8 = vadd.f32 %v3334_v2, %v1408_v4 }
 0x1eb   :  { %v1955_v46 = vmax.f32 %v1566_v0, 0.0  ;;  %v2019_v9 = vmax.f32 %v1726_v1, 0.0 }
 0x1ec   :  { %v1828_v10 = vmax.f32 %v1249_v7, 0.0  ;;  %v1892_v11 = vmax.f32 %v1409_v8, 0.0  ;;  %1287 = vmatmul.bf16.gmra.mxu0 %v2969_v62  ;;  %1447 = vmatmul.bf16.gmra.mxu1 %v3001_v63 }
 0x1ed   :  { %v2235_v12 = vadd.f32 %v2234_v56, %v1955_v46  ;;  %v2309_v13 = vadd.f32 %v2308_v57, %v2019_v9  ;;  %1607 = vmatmul.bf16.gmra.mxu2 %v3033_v5  ;;  %1767 = vmatmul.bf16.gmra.mxu3 %v3065_v6 }
 0x1ee   :  { %v2088_v14 = vadd.f32 %v2087_v58, %v1828_v10  ;;  %v2162_v15 = vadd.f32 %v2161_v59, %v1892_v11  ;;  %v2971_v11 = vld [vmem:[#allocation2 + $0xf0] sm:$0xff] }
 0x1f0   :  { %v1568_v16 = vpop.f32.mrf.mxu2  ;;  %v1728_v17 = vpop.f32.mrf.mxu3 }
 0x1f1   :  { %v1569_v18 = vadd.f32 %v3334_v2, %v1568_v16  ;;  %v1729_v19 = vadd.f32 %v3334_v2, %v1728_v17  ;;  %v1250_v20 = vpop.f32.mrf.mxu0  ;;  %v1410_v21 = vpop.f32.mrf.mxu1  ;;  %v3035_v17 = vld [vmem:[#allocation2 + $0x2f0] sm:$0xff] }
 0x1f2   :  { %v1251_v22 = vadd.f32 %v3334_v2, %v1250_v20  ;;  %v1411_v23 = vadd.f32 %v3334_v2, %v1410_v21 }
 0x1f3   :  { %v1956_v24 = vmax.f32 %v1569_v18, 0.0  ;;  %v2020_v25 = vmax.f32 %v1729_v19, 0.0  ;;  %v3067_v18 = vld [vmem:[#allocation2 + $0x3f0] sm:$0xff] }
 0x1f4   :  { %v1829_v26 = vmax.f32 %v1251_v22, 0.0  ;;  %v1893_v27 = vmax.f32 %v1411_v23, 0.0 }
 0x1f5   :  { %v2236_v28 = vadd.f32 %v2235_v12, %v1956_v24  ;;  %v2310_v29 = vadd.f32 %v2309_v13, %v2020_v25  ;;  %v3003_v12 = vld [vmem:[#allocation2 + $0x1f0] sm:$0xff] }
 0x1f6   :  { %v2089_v30 = vadd.f32 %v2088_v14, %v1829_v26  ;;  %v2163_v31 = vadd.f32 %v2162_v15, %v1893_v27 }
 0x1f8   :  { %v1570_v32 = vpop.f32.mrf.mxu2  ;;  %v1730_v33 = vpop.f32.mrf.mxu3 }
 0x1f9   :  { %v1571_v38 = vadd.f32 %v3334_v2, %v1570_v32  ;;  %v1731_v39 = vadd.f32 %v3334_v2, %v1730_v33  ;;  %v1253_v40 = vpop.f32.mrf.mxu0  ;;  %v1413_v41 = vpop.f32.mrf.mxu1 }
 0x1fa   :  { %v1254_v44 = vadd.f32 %v3334_v2, %v1253_v40  ;;  %v1414_v45 = vadd.f32 %v3334_v2, %v1413_v41 }
 0x1fb   :  { %v1957_v47 = vmax.f32 %v1571_v38, 0.0  ;;  %v2021_v48 = vmax.f32 %v1731_v39, 0.0 }
 0x1fc   :  { %v1830_v49 = vmax.f32 %v1254_v44, 0.0  ;;  %v1894_v52 = vmax.f32 %v1414_v45, 0.0  ;;  %1292 = vmatmul.bf16.gmra.mxu0 %v2970_v34  ;;  %1452 = vmatmul.bf16.gmra.mxu1 %v3002_v37 }
 0x1fd   :  { %v2237_v53 = vadd.f32 %v2236_v28, %v1957_v47  ;;  %v2311_v54 = vadd.f32 %v2310_v29, %v2021_v48  ;;  %1612 = vmatmul.bf16.gmra.mxu2 %v3034_v42  ;;  %1772 = vmatmul.bf16.gmra.mxu3 %v3066_v43 }
 0x1fe   :  { %v2090_v55 = vadd.f32 %v2089_v30, %v1830_v49  ;;  %v2164_v56 = vadd.f32 %v2163_v31, %v1894_v52  ;;  %v2972_v52 = vld [vmem:[#allocation2 + $0xf8] sm:$0xff] }
 0x200   :  { %v1573_v57 = vpop.f32.mrf.mxu2  ;;  %v1733_v58 = vpop.f32.mrf.mxu3 }
 0x201   :  { %v1574_v59 = vadd.f32 %v3334_v2, %v1573_v57  ;;  %v1734_v60 = vadd.f32 %v3334_v2, %v1733_v58  ;;  %v1255_v61 = vpop.f32.mrf.mxu0  ;;  %v1415_v62 = vpop.f32.mrf.mxu1  ;;  %v3036_v58 = vld [vmem:[#allocation2 + $0x2f8] sm:$0xff] }
 0x202   :  { %v1256_v63 = vadd.f32 %v3334_v2, %v1255_v61  ;;  %v1416_v0 = vadd.f32 %v3334_v2, %v1415_v62 }
 0x203   :  { %v1958_v1 = vmax.f32 %v1574_v59, 0.0  ;;  %v2022_v3 = vmax.f32 %v1734_v60, 0.0  ;;  %v3068_v59 = vld [vmem:[#allocation2 + $0x3f8] sm:$0xff] }
 0x204   :  { %v1831_v4 = vmax.f32 %v1256_v63, 0.0  ;;  %v1895_v5 = vmax.f32 %v1416_v0, 0.0 }
 0x205   :  { %v2238_v6 = vadd.f32 %v2237_v53, %v1958_v1  ;;  %v2312_v7 = vadd.f32 %v2311_v54, %v2022_v3  ;;  %v3004_v53 = vld [vmem:[#allocation2 + $0x1f8] sm:$0xff] }
 0x206   :  { %v2091_v8 = vadd.f32 %v2090_v55, %v1831_v4  ;;  %v2165_v46 = vadd.f32 %v2164_v56, %v1895_v5 }
 0x208   :  { %v1575_v9 = vpop.f32.mrf.mxu2  ;;  %v1735_v10 = vpop.f32.mrf.mxu3 }
 0x209   :  { %v1576_v13 = vadd.f32 %v3334_v2, %v1575_v9  ;;  %v1736_v14 = vadd.f32 %v3334_v2, %v1735_v10  ;;  %v1258_v15 = vpop.f32.mrf.mxu0  ;;  %v1418_v16 = vpop.f32.mrf.mxu1 }
 0x20a   :  { %v1259_v19 = vadd.f32 %v3334_v2, %v1258_v15  ;;  %v1419_v20 = vadd.f32 %v3334_v2, %v1418_v16 }
 0x20b   :  { %v1959_v21 = vmax.f32 %v1576_v13, 0.0  ;;  %v2023_v22 = vmax.f32 %v1736_v14, 0.0 }
 0x20c   :  { %v1832_v23 = vmax.f32 %v1259_v19, 0.0  ;;  %v1896_v24 = vmax.f32 %v1419_v20, 0.0  ;;  %1297 = vmatmul.bf16.gmra.mxu0 %v2971_v11  ;;  %1457 = vmatmul.bf16.gmra.mxu1 %v3003_v12 }
 0x20d   :  { %v2239_v25 = vadd.f32 %v2238_v6, %v1959_v21  ;;  %v2313_v26 = vadd.f32 %v2312_v7, %v2023_v22  ;;  %1617 = vmatmul.bf16.gmra.mxu2 %v3035_v17  ;;  %1777 = vmatmul.bf16.gmra.mxu3 %v3067_v18 }
 0x20e   :  { %v2092_v27 = vadd.f32 %v2091_v8, %v1832_v23  ;;  %v2166_v28 = vadd.f32 %v2165_v46, %v1896_v24 }
 0x210   :  { %v1578_v29 = vpop.f32.mrf.mxu2  ;;  %v1738_v30 = vpop.f32.mrf.mxu3 }
 0x211   :  { %v1579_v31 = vadd.f32 %v3334_v2, %v1578_v29  ;;  %v1739_v32 = vadd.f32 %v3334_v2, %v1738_v30  ;;  %v1260_v33 = vpop.f32.mrf.mxu0  ;;  %v1420_v34 = vpop.f32.mrf.mxu1 }
 0x212   :  { %v1261_v37 = vadd.f32 %v3334_v2, %v1260_v33  ;;  %v1421_v38 = vadd.f32 %v3334_v2, %v1420_v34 }
 0x213   :  { %v1960_v39 = vmax.f32 %v1579_v31, 0.0  ;;  %v2024_v40 = vmax.f32 %v1739_v32, 0.0 }
 0x214   :  { %v1833_v41 = vmax.f32 %v1261_v37, 0.0  ;;  %v1897_v42 = vmax.f32 %v1421_v38, 0.0 }
 0x215   :  { %v2240_v43 = vadd.f32 %v2239_v25, %v1960_v39  ;;  %v2314_v44 = vadd.f32 %v2313_v26, %v2024_v40 }
 0x216   :  { %v2093_v45 = vadd.f32 %v2092_v27, %v1833_v41  ;;  %v2167_v47 = vadd.f32 %v2166_v28, %v1897_v42 }
 0x218   :  { %v1580_v48 = vpop.f32.mrf.mxu2  ;;  %v1740_v49 = vpop.f32.mrf.mxu3 }
 0x219   :  { %v1581_v54 = vadd.f32 %v3334_v2, %v1580_v48  ;;  %v1741_v55 = vadd.f32 %v3334_v2, %v1740_v49  ;;  %v1263_v56 = vpop.f32.mrf.mxu0  ;;  %v1423_v57 = vpop.f32.mrf.mxu1 }
 0x21a   :  { %v1264_v60 = vadd.f32 %v3334_v2, %v1263_v56  ;;  %v1424_v61 = vadd.f32 %v3334_v2, %v1423_v57 }
 0x21b   :  { %v1961_v62 = vmax.f32 %v1581_v54, 0.0  ;;  %v2025_v63 = vmax.f32 %v1741_v55, 0.0 }
 0x21c   :  { %v1834_v0 = vmax.f32 %v1264_v60, 0.0  ;;  %v1898_v1 = vmax.f32 %v1424_v61, 0.0  ;;  %1302 = vmatmul.bf16.gmra.mxu0 %v2972_v52  ;;  %1462 = vmatmul.bf16.gmra.mxu1 %v3004_v53 }
 0x21d   :  { %v2241_v3 = vadd.f32 %v2240_v43, %v1961_v62  ;;  %v2315_v4 = vadd.f32 %v2314_v44, %v2025_v63  ;;  %1622 = vmatmul.bf16.gmra.mxu2 %v3036_v58  ;;  %1782 = vmatmul.bf16.gmra.mxu3 %v3068_v59 }
 0x21e   :  { %v2094_v5 = vadd.f32 %v2093_v45, %v1834_v0  ;;  %v2168_v6 = vadd.f32 %v2167_v47, %v1898_v1 }
 0x220   :  { %v1583_v7 = vpop.f32.mrf.mxu2  ;;  %v1743_v8 = vpop.f32.mrf.mxu3 }
 0x221   :  { %v1584_v46 = vadd.f32 %v3334_v2, %v1583_v7  ;;  %v1744_v9 = vadd.f32 %v3334_v2, %v1743_v8  ;;  %v1265_v10 = vpop.f32.mrf.mxu0  ;;  %v1425_v11 = vpop.f32.mrf.mxu1 }
 0x222   :  { %v1266_v12 = vadd.f32 %v3334_v2, %v1265_v10  ;;  %v1426_v13 = vadd.f32 %v3334_v2, %v1425_v11 }
 0x223   :  { %v1962_v14 = vmax.f32 %v1584_v46, 0.0  ;;  %v2026_v15 = vmax.f32 %v1744_v9, 0.0 }
 0x224   :  { %v1835_v16 = vmax.f32 %v1266_v12, 0.0  ;;  %v1899_v17 = vmax.f32 %v1426_v13, 0.0 }
 0x225   :  { %v2242_v18 = vadd.f32 %v2241_v3, %v1962_v14  ;;  %v2316_v19 = vadd.f32 %v2315_v4, %v2026_v15 }
 0x226   :  { %v2095_v20 = vadd.f32 %v2094_v5, %v1835_v16  ;;  %v2169_v21 = vadd.f32 %v2168_v6, %v1899_v17 }
 0x228   :  { %v1585_v22 = vpop.f32.mrf.mxu2  ;;  %v1745_v23 = vpop.f32.mrf.mxu3 }
 0x229   :  { %v1586_v24 = vadd.f32 %v3334_v2, %v1585_v22  ;;  %v1746_v25 = vadd.f32 %v3334_v2, %v1745_v23  ;;  %v1268_v26 = vpop.f32.mrf.mxu0  ;;  %v1428_v27 = vpop.f32.mrf.mxu1 }
 0x22a   :  { %v1269_v28 = vadd.f32 %v3334_v2, %v1268_v26  ;;  %v1429_v29 = vadd.f32 %v3334_v2, %v1428_v27 }
 0x22b   :  { %v1963_v30 = vmax.f32 %v1586_v24, 0.0  ;;  %v2027_v31 = vmax.f32 %v1746_v25, 0.0 }
 0x22c   :  { %v1836_v32 = vmax.f32 %v1269_v28, 0.0  ;;  %v1900_v33 = vmax.f32 %v1429_v29, 0.0 }
 0x22d   :  { %v2243_v34 = vadd.f32 %v2242_v18, %v1963_v30  ;;  %v2317_v37 = vadd.f32 %v2316_v19, %v2027_v31 }
 0x22e   :  { %v2096_v38 = vadd.f32 %v2095_v20, %v1836_v32  ;;  %v2170_v39 = vadd.f32 %v2169_v21, %v1900_v33 }
 0x230   :  { %v1588_v40 = vpop.f32.mrf.mxu2  ;;  %v1748_v41 = vpop.f32.mrf.mxu3 }
 0x231   :  { %v1589_v42 = vadd.f32 %v3334_v2, %v1588_v40  ;;  %v1749_v43 = vadd.f32 %v3334_v2, %v1748_v41  ;;  %v1270_v44 = vpop.f32.mrf.mxu0  ;;  %v1430_v45 = vpop.f32.mrf.mxu1 }
 0x232   :  { %v1271_v47 = vadd.f32 %v3334_v2, %v1270_v44  ;;  %v1431_v48 = vadd.f32 %v3334_v2, %v1430_v45 }
 0x233   :  { %v1964_v49 = vmax.f32 %v1589_v42, 0.0  ;;  %v2028_v52 = vmax.f32 %v1749_v43, 0.0 }
 0x234   :  { %v1837_v53 = vmax.f32 %v1271_v47, 0.0  ;;  %v1901_v54 = vmax.f32 %v1431_v48, 0.0 }
 0x235   :  { %v2244_v55 = vadd.f32 %v2243_v34, %v1964_v49  ;;  %v2318_v56 = vadd.f32 %v2317_v37, %v2028_v52 }
 0x236   :  { %v2097_v57 = vadd.f32 %v2096_v38, %v1837_v53  ;;  %v2171_v58 = vadd.f32 %v2170_v39, %v1901_v54 }
 0x238   :  { %v1590_v59 = vpop.f32.mrf.mxu2  ;;  %v1750_v60 = vpop.f32.mrf.mxu3 }
 0x239   :  { %v1591_v61 = vadd.f32 %v3334_v2, %v1590_v59  ;;  %v1751_v62 = vadd.f32 %v3334_v2, %v1750_v60  ;;  %v1273_v63 = vpop.f32.mrf.mxu0  ;;  %v1433_v0 = vpop.f32.mrf.mxu1 }
 0x23a   :  { %v1274_v1 = vadd.f32 %v3334_v2, %v1273_v63  ;;  %v1434_v3 = vadd.f32 %v3334_v2, %v1433_v0 }
 0x23b   :  { %v1965_v4 = vmax.f32 %v1591_v61, 0.0  ;;  %v2029_v5 = vmax.f32 %v1751_v62, 0.0 }
 0x23c   :  { %v1838_v6 = vmax.f32 %v1274_v1, 0.0  ;;  %v1902_v7 = vmax.f32 %v1434_v3, 0.0 }
 0x23d   :  { %v2245_v8 = vadd.f32 %v2244_v55, %v1965_v4  ;;  %v2319_v46 = vadd.f32 %v2318_v56, %v2029_v5 }
 0x23e   :  { %v2098_v9 = vadd.f32 %v2097_v57, %v1838_v6  ;;  %v2172_v10 = vadd.f32 %v2171_v58, %v1902_v7 }
 0x240   :  { %v1593_v11 = vpop.f32.mrf.mxu2  ;;  %v1753_v12 = vpop.f32.mrf.mxu3 }
 0x241   :  { %v1594_v13 = vadd.f32 %v3334_v2, %v1593_v11  ;;  %v1754_v14 = vadd.f32 %v3334_v2, %v1753_v12  ;;  %v1275_v15 = vpop.f32.mrf.mxu0  ;;  %v1435_v16 = vpop.f32.mrf.mxu1 }
 0x242   :  { %v1276_v17 = vadd.f32 %v3334_v2, %v1275_v15  ;;  %v1436_v18 = vadd.f32 %v3334_v2, %v1435_v16 }
 0x243   :  { %v1966_v19 = vmax.f32 %v1594_v13, 0.0  ;;  %v2030_v20 = vmax.f32 %v1754_v14, 0.0 }
 0x244   :  { %v1839_v21 = vmax.f32 %v1276_v17, 0.0  ;;  %v1903_v22 = vmax.f32 %v1436_v18, 0.0 }
 0x245   :  { %v2246_v23 = vadd.f32 %v2245_v8, %v1966_v19  ;;  %v2320_v24 = vadd.f32 %v2319_v46, %v2030_v20  ;;  %v2075_v20 = vrot.slane %v3358_v35, 4 }
 0x246   :  { %v2099_v25 = vadd.f32 %v2098_v9, %v1839_v21  ;;  %v2173_v26 = vadd.f32 %v2172_v10, %v1903_v22  ;;  %v3194_v9 = vmov 256.0   ;;  %v2149_v21 = vrot.slane %v3360_v36, 4 }
 0x247   :  { %3108 = vrcp.f32 %v3194_v9 }
 0x248   :  { %v1595_v27 = vpop.f32.mrf.mxu2  ;;  %v1755_v28 = vpop.f32.mrf.mxu3 }
 0x249   :  { %v1596_v29 = vadd.f32 %v3334_v2, %v1595_v27  ;;  %v1756_v30 = vadd.f32 %v3334_v2, %v1755_v28  ;;  %v1278_v31 = vpop.f32.mrf.mxu0  ;;  %v1438_v32 = vpop.f32.mrf.mxu1  ;;  %v3496_v27 = vadd.f32 %v2149_v21, %v3360_v36 }
 0x24a   :  { %v1279_v33 = vadd.f32 %v3334_v2, %v1278_v31  ;;  %v1439_v34 = vadd.f32 %v3334_v2, %v1438_v32  ;;  %v2223_v31 = vrot.slane %v3364_v50, 4 }
 0x24b   :  { %v1967_v37 = vmax.f32 %v1596_v29, 0.0  ;;  %v2031_v38 = vmax.f32 %v1756_v30, 0.0 }
 0x24c   :  { %v1840_v39 = vmax.f32 %v1279_v33, 0.0  ;;  %v1904_v40 = vmax.f32 %v1439_v34, 0.0 }
 0x24d   :  { %v2247_v41 = vadd.f32 %v2246_v23, %v1967_v37  ;;  %v2321_v42 = vadd.f32 %v2320_v24, %v2031_v38  ;;  %v3472_v14 = vpop.eup %3108  ;;  %v3488_v23 = vld [vmem:[%s3602_s2] ss:$0 sm:$0xff]  ;;  %s3195_s2 = smov [#allocation7]  }
 0x24e   :  { %v3450_v43 = vadd.f32 %v2099_v25, %v1840_v39  ;;  %v3452_v44 = vadd.f32 %v2173_v26, %v1904_v40  ;;  %v2341_v15 = vmul.f32 256.0, %v3472_v14  ;;  %v3493_v26 = vadd.f32 %v2075_v20, %v3358_v35  ;;  %s2384_s28 = sshll.u32 %s3195_s2, 4  ;;  %s2385_s28 = int_to_ptr.vmem [resolvable:$true] %s2384_s28 }
 0x24f   :  { %vm2345_vm0 = vweird.f32 %v3472_v14 }
 0x250   :  { %v1598_v45 = vpop.f32.mrf.mxu2  ;;  %v1758_v47 = vpop.f32.mrf.mxu3  ;;  %v2342_v22 = vsub.f32 1.0, %v2341_v15  ;;  %v2077_v40 = vrot.slane %v3493_v26, 2 }
 0x251   :  { %v1599_v48 = vadd.f32 %v3334_v2, %v1598_v45  ;;  %v1759_v49 = vadd.f32 %v3334_v2, %v1758_v47  ;;  %v1280_v52 = vpop.f32.mrf.mxu0  ;;  %v1440_v53 = vpop.f32.mrf.mxu1 }
 0x252   :  { %v1281_v24 = vadd.f32 %v3488_v23, %v1280_v52  ;;  %v1441_v25 = vadd.f32 %v3488_v23, %v1440_v53  ;;  %v3501_v30 = vmul.f32 %v3472_v14, %v2342_v22  ;;  %v3521_v53 = vadd.f32 %v2223_v31, %v3364_v50 }
 0x253   :  { %v1968_v54 = vmax.f32 %v1599_v48, 0.0  ;;  %v2032_v55 = vmax.f32 %v1759_v49, 0.0 }
 0x254   :  { %v1841_v34 = vmax.f32 %v1281_v24, 0.0  ;;  %v1905_v37 = vmax.f32 %v1441_v25, 0.0 }
 0x255   :  { %v3456_v56 = vadd.f32 %v2247_v41, %v1968_v54  ;;  %v3458_v57 = vadd.f32 %v2321_v42, %v2032_v55  ;;  %v2151_v41 = vrot.slane %v3496_v27, 2  ;;  %v2297_v54 = vrot.slane %v3366_v51, 4 }
 0x258   :  { %v1600_v58 = vpop.f32.mrf.mxu2  ;;  %v1760_v59 = vpop.f32.mrf.mxu3 }
 0x259   :  { %v1283_v60 = vpop.f32.mrf.mxu0  ;;  %v1443_v61 = vpop.f32.mrf.mxu1  ;;  %v1601_v28 = vadd.f32 %v3488_v23, %v1600_v58  ;;  %v1761_v29 = vadd.f32 %v3488_v23, %v1760_v59  ;;  %v2101_v59 = vadd.f32 %v3450_v43, %v1841_v34 }
 0x25a   :  { %v1284_v35 = vadd.f32 %v3488_v23, %v1283_v60  ;;  %v1444_v36 = vadd.f32 %v3488_v23, %v1443_v61  ;;  %v2175_v60 = vadd.f32 %v3452_v44, %v1905_v37 }
 0x25b   :  { %v1969_v47 = vmax.f32 %v1601_v28, 0.0  ;;  %v2033_v48 = vmax.f32 %v1761_v29, 0.0 }
 0x25c   :  { %v1842_v61 = vmax.f32 %v1284_v35, 0.0 }
 0x25d   :  { %v2249_v50 = vadd.f32 %v3456_v56, %v1969_v47  ;;  %v2323_v15 = vadd.f32 %v3458_v57, %v2033_v48 }
 0x25e   :  { %v2102_v25 = vadd.f32 %v2101_v59, %v1842_v61 }
 0x260   :  { %v1603_v62 = vpop.f32.mrf.mxu2  ;;  %v1763_v63 = vpop.f32.mrf.mxu3 }
 0x261   :  { %v1285_v0 = vpop.f32.mrf.mxu0  ;;  %v1445_v1 = vpop.f32.mrf.mxu1  ;;  %v1604_v42 = vadd.f32 %v3488_v23, %v1603_v62  ;;  %v1764_v45 = vadd.f32 %v3488_v23, %v1763_v63  ;;  %v1906_v62 = vmax.f32 %v1444_v36, 0.0 }
 0x262   :  { %v1286_v49 = vadd.f32 %v3488_v23, %v1285_v0  ;;  %v1446_v52 = vadd.f32 %v3488_v23, %v1445_v1 }
 0x263   :  { %v1970_v63 = vmax.f32 %v1604_v42, 0.0  ;;  %v2034_v9 = vmax.f32 %v1764_v45, 0.0 }
 0x264   :  { %v1843_v20 = vmax.f32 %v1286_v49, 0.0 }
 0x265   :  { %v2250_v29 = vadd.f32 %v2249_v50, %v1970_v63  ;;  %v2324_v31 = vadd.f32 %v2323_v15, %v2034_v9 }
 0x266   :  { %v2103_v37 = vadd.f32 %v2102_v25, %v1843_v20 }
 0x268   :  { %v1605_v3 = vpop.f32.mrf.mxu2  ;;  %v1765_v4 = vpop.f32.mrf.mxu3 }
 0x269   :  { %v1288_v5 = vpop.f32.mrf.mxu0  ;;  %v1448_v2 = vpop.f32.mrf.mxu1  ;;  %v1606_v55 = vadd.f32 %v3488_v23, %v1605_v3  ;;  %v1766_v58 = vadd.f32 %v3488_v23, %v1765_v4  ;;  %v1907_v3 = vmax.f32 %v1446_v52, 0.0 }
 0x26a   :  { %v1289_v0 = vadd.f32 %v3488_v23, %v1288_v5  ;;  %v1449_v1 = vadd.f32 %v3488_v23, %v1448_v2  ;;  %v2176_v5 = vadd.f32 %v2175_v60, %v1906_v62 }
 0x26b   :  { %v1971_v21 = vmax.f32 %v1606_v55, 0.0  ;;  %v2035_v4 = vmax.f32 %v1766_v58, 0.0 }
 0x26c   :  { %v1844_v34 = vmax.f32 %v1289_v0, 0.0 }
 0x26d   :  { %v2251_v42 = vadd.f32 %v2250_v29, %v1971_v21  ;;  %v2325_v45 = vadd.f32 %v2324_v31, %v2035_v4 }
 0x26e   :  { %v2104_v55 = vadd.f32 %v2103_v37, %v1844_v34 }
 0x270   :  { %v1608_v6 = vpop.f32.mrf.mxu2  ;;  %v1768_v7 = vpop.f32.mrf.mxu3 }
 0x271   :  { %v3460_v8 = vpop.f32.mrf.mxu0  ;;  %v3462_v46 = vpop.f32.mrf.mxu1  ;;  %v1609_v43 = vadd.f32 %v3488_v23, %v1608_v6  ;;  %v1769_v44 = vadd.f32 %v3488_v23, %v1768_v7  ;;  %v1908_v6 = vmax.f32 %v1449_v1, 0.0  ;;  %v2177_v7 = vadd.f32 %v2176_v5, %v1907_v3 }
 0x272   :  { %v1291_v2 = vadd.f32 %v3488_v23, %v3460_v8  ;;  %v1451_v56 = vadd.f32 %v3488_v23, %v3462_v46 }
 0x273   :  { %v1972_v8 = vmax.f32 %v1609_v43, 0.0  ;;  %v2036_v47 = vmax.f32 %v1769_v44, 0.0  ;;  %v2178_v58 = vadd.f32 %v2177_v7, %v1908_v6 }
 0x274   :  { %v1845_v48 = vmax.f32 %v1291_v2, 0.0  ;;  %v1909_v46 = vmax.f32 %v1451_v56, 0.0 }
 0x275   :  { %v2326_v63 = vadd.f32 %v2325_v45, %v2036_v47 }
 0x276   :  { %v2105_v1 = vadd.f32 %v2104_v55, %v1845_v48 }
 0x278   :  { %v3464_v10 = vpop.f32.mrf.mxu2  ;;  %v3466_v11 = vpop.f32.mrf.mxu3 }
 0x279   :  { %v3468_v12 = vpop.f32.mrf.mxu0  ;;  %v3470_v13 = vpop.f32.mrf.mxu1  ;;  %v1611_v49 = vadd.f32 %v3488_v23, %v3464_v10  ;;  %v1771_v52 = vadd.f32 %v3488_v23, %v3466_v11  ;;  %v2252_v10 = vadd.f32 %v2251_v42, %v1972_v8 }
 0x27a   :  { %v1294_v35 = vadd.f32 %v3488_v23, %v3468_v12  ;;  %v1454_v36 = vadd.f32 %v3488_v23, %v3470_v13 }
 0x27b   :  { %v1973_v50 = vmax.f32 %v1611_v49, 0.0  ;;  %v2037_v15 = vmax.f32 %v1771_v52, 0.0 }
 0x27c   :  { %v1846_v59 = vmax.f32 %v1294_v35, 0.0  ;;  %v1910_v60 = vmax.f32 %v1454_v36, 0.0 }
 0x27d   :  { %v2253_v29 = vadd.f32 %v2252_v10, %v1973_v50  ;;  %v2327_v31 = vadd.f32 %v2326_v63, %v2037_v15 }
 0x27e   :  { %v2106_v43 = vadd.f32 %v2105_v1, %v1846_v59 }
 0x280   :  { %v3475_v16 = vpop.f32.mrf.mxu2  ;;  %v3477_v17 = vpop.f32.mrf.mxu3 }
 0x281   :  { %v3479_v18 = vpop.f32.mrf.mxu0  ;;  %v3481_v19 = vpop.f32.mrf.mxu1  ;;  %v1614_v61 = vadd.f32 %v3488_v23, %v3475_v16  ;;  %v1774_v62 = vadd.f32 %v3488_v23, %v3477_v17 }
 0x282   :  { %v1296_v12 = vadd.f32 %v3488_v23, %v3479_v18  ;;  %v1456_v13 = vadd.f32 %v3488_v23, %v3481_v19  ;;  %v2179_v19 = vadd.f32 %v2178_v58, %v1909_v46 }
 0x283   :  { %v2038_v25 = vmax.f32 %v1774_v62, 0.0 }
 0x284   :  { %v1847_v16 = vmax.f32 %v1296_v12, 0.0  ;;  %v1911_v21 = vmax.f32 %v1456_v13, 0.0  ;;  %v2180_v44 = vadd.f32 %v2179_v19, %v1910_v60 }
 0x285   :  { %v2328_v36 = vadd.f32 %v2327_v31, %v2038_v25  ;;  %v2298_v25 = vadd.f32 %v2297_v54, %v3366_v51 }
 0x286   :  { %v2107_v6 = vadd.f32 %v2106_v43, %v1847_v16 }
 0x287   :  { %v2299_v51 = vrot.slane %v2298_v25, 2 }
 0x288   :  { %v3504_v32 = vpop.f32.mrf.mxu2  ;;  %v3506_v33 = vpop.f32.mrf.mxu3 }
 0x289   :  { %v3510_v38 = vpop.f32.mrf.mxu0  ;;  %v3512_v39 = vpop.f32.mrf.mxu1  ;;  %v1616_v34 = vadd.f32 %v3488_v23, %v3504_v32 }
 0x28a   :  { %v1299_v11 = vadd.f32 %v3488_v23, %v3510_v38  ;;  %v1459_v9 = vadd.f32 %v3488_v23, %v3512_v39  ;;  %v1974_v38 = vmax.f32 %v1614_v61, 0.0 }
 0x28b   :  { %v1975_v52 = vmax.f32 %v1616_v34, 0.0 }
 0x28c   :  { %v1848_v5 = vmax.f32 %v1299_v11, 0.0  ;;  %v1912_v39 = vmax.f32 %v1459_v9, 0.0  ;;  %v2254_v35 = vadd.f32 %v2253_v29, %v1974_v38  ;;  %v2152_v38 = vadd.f32 %v2151_v41, %v3496_v27 }
 0x28e   :  { %v2108_v8 = vadd.f32 %v2107_v6, %v1848_v5  ;;  %v2255_v19 = vadd.f32 %v2254_v35, %v1975_v52 }
 0x290   :  { %v3534_v22 = vpop.f32.mrf.mxu2  ;;  %v3536_v24 = vpop.f32.mrf.mxu3 }
 0x291   :  { %v1300_v57 = vpop.f32.mrf.mxu0  ;;  %v1460_v28 = vpop.f32.mrf.mxu1  ;;  %v1619_v42 = vadd.f32 %v3488_v23, %v3534_v22  ;;  %v1779_v45 = vadd.f32 %v3488_v23, %v3536_v24 }
 0x292   :  { %v1301_v17 = vadd.f32 %v3488_v23, %v1300_v57  ;;  %v1461_v4 = vadd.f32 %v3488_v23, %v1460_v28  ;;  %v1776_v57 = vadd.f32 %v3488_v23, %v3506_v33  ;;  %v2181_v28 = vadd.f32 %v2180_v44, %v1911_v21 }
 0x293   :  { %v1976_v61 = vmax.f32 %v1619_v42, 0.0  ;;  %v2040_v62 = vmax.f32 %v1779_v45, 0.0  ;;  %v2153_v42 = vrot.slane %v2152_v38, 1 }
 0x294   :  { %v1849_v37 = vmax.f32 %v1301_v17, 0.0  ;;  %v1913_v7 = vmax.f32 %v1461_v4, 0.0  ;;  %v2182_v47 = vadd.f32 %v2181_v28, %v1912_v39  ;;  %v2039_v33 = vmax.f32 %v1776_v57, 0.0 }
 0x295   :  { %v2256_v17 = vadd.f32 %v2255_v19, %v1976_v61 }
 0x296   :  { %v2109_v59 = vadd.f32 %v2108_v8, %v1849_v37  ;;  %v2183_v60 = vadd.f32 %v2182_v47, %v1913_v7 }
 0x298   :  { %v1620_v18 = vpop.f32.mrf.mxu2  ;;  %v1780_v0 = vpop.f32.mrf.mxu3 }
 0x299   :  { %v1303_v20 = vpop.f32.mrf.mxu0  ;;  %v1463_v3 = vpop.f32.mrf.mxu1  ;;  %v1621_v55 = vadd.f32 %v3488_v23, %v1620_v18  ;;  %v1781_v58 = vadd.f32 %v3488_v23, %v1780_v0  ;;  %v2329_v0 = vadd.f32 %v2328_v36, %v2039_v33  ;;  %v2344_v36 = vadd.f32 %v3472_v14, %v3501_v30 }
 0x29a   :  { %v1304_v2 = vadd.f32 %v3488_v23, %v1303_v20  ;;  %v1464_v56 = vadd.f32 %v3488_v23, %v1463_v3  ;;  %v2078_v20 = vadd.f32 %v2077_v40, %v3493_v26  ;;  %v2225_v3 = vrot.slane %v3521_v53, 2 }
 0x29b   :  { %v1977_v50 = vmax.f32 %v1621_v55, 0.0  ;;  %v2041_v15 = vmax.f32 %v1781_v58, 0.0  ;;  %v2330_v4 = vadd.f32 %v2329_v0, %v2040_v62  ;;  %v2346_v55 = vsel %vm2345_vm0, %v3472_v14, %v2344_v36 }
 0x29c   :  { %v1850_v48 = vmax.f32 %v1304_v2, 0.0  ;;  %v1914_v46 = vmax.f32 %v1464_v56, 0.0  ;;  %v2226_v34 = vadd.f32 %v2225_v3, %v3521_v53  ;;  %v2079_v7 = vrot.slane %v2078_v20, 1 }
 0x29d   :  { %v2257_v40 = vadd.f32 %v2256_v17, %v1977_v50  ;;  %v2331_v56 = vadd.f32 %v2330_v4, %v2041_v15  ;;  %v2154_v58 = vadd.f32 %v2153_v42, %v2152_v38 }
 0x29e   :  { %v2110_v11 = vadd.f32 %v2109_v59, %v1850_v48  ;;  %v2184_v9 = vadd.f32 %v2183_v60, %v1914_v46  ;;  %v2227_v47 = vrot.slane %v2226_v34, 1 }
 0x2a0   :  { %v1623_v32 = vpop.f32.mrf.mxu2  ;;  %v1783_v49 = vpop.f32.mrf.mxu3  ;;  %v2228_v60 = vadd.f32 %v2227_v47, %v2226_v34 }
 0x2a1   :  { %v1305_v12 = vpop.f32.mrf.mxu0  ;;  %v1465_v13 = vpop.f32.mrf.mxu1  ;;  %v1624_v10 = vadd.f32 %v3488_v23, %v1623_v32  ;;  %v1784_v63 = vadd.f32 %v3488_v23, %v1783_v49  ;;  %v2080_v32 = vadd.f32 %v2079_v7, %v2078_v20  ;;  %v2300_v49 = vadd.f32 %v2299_v51, %v2298_v25 }
 0x2a2   :  { %v1306_v22 = vadd.f32 %v3488_v23, %v1305_v12  ;;  %v1466_v24 = vadd.f32 %v3488_v23, %v1465_v13  ;;  %v2351_v14 = vmul.f32 %v2346_v55, %v2228_v60 }
 0x2a3   :  { %v1978_v43 = vmax.f32 %v1624_v10, 0.0  ;;  %v2042_v44 = vmax.f32 %v1784_v63, 0.0  ;;  %v2347_v61 = vmul.f32 %v2346_v55, %v2080_v32  ;;  %v2301_v62 = vrot.slane %v2300_v49, 1 }
 0x2a4   :  { %v1851_v1 = vmax.f32 %v1306_v22, 0.0  ;;  %v1915_v18 = vmax.f32 %v1466_v24, 0.0  ;;  %v2349_v63 = vmul.f32 %v2346_v55, %v2154_v58 }
 0x2a5   :  { %v2258_v28 = vadd.f32 %v2257_v40, %v1978_v43  ;;  %v2332_v27 = vadd.f32 %v2331_v56, %v2042_v44  ;;  %v2302_v15 = vadd.f32 %v2301_v62, %v2300_v49 }
 0x2a6   :  { %v2111_v16 = vadd.f32 %v2110_v11, %v1851_v1  ;;  %v2185_v21 = vadd.f32 %v2184_v9, %v1915_v18 }
 0x2a7   :  { %v2353_v4 = vmul.f32 %v2346_v55, %v2302_v15 }
 0x2a8   :  { %v2112_v5 = vrot.slane %v2111_v16, 4  ;;  %v2186_v39 = vrot.slane %v2185_v21, 4  ;;  %v1625_v2 = vpop.f32.mrf.mxu2  ;;  %v1785_v26 = vpop.f32.mrf.mxu3 }
 0x2a9   :  { %v1626_v29 = vadd.f32 %v3488_v23, %v1625_v2  ;;  %v1786_v31 = vadd.f32 %v3488_v23, %v1785_v26 }
 0x2aa   :  { %v2113_v57 = vadd.f32 %v2112_v5, %v2111_v16  ;;  %v2187_v6 = vadd.f32 %v2186_v39, %v2185_v21 }
 0x2ab   :  { %v1979_v41 = vmax.f32 %v1626_v29, 0.0  ;;  %v2043_v37 = vmax.f32 %v1786_v31, 0.0 }
 0x2ac   :  { %v2114_v54 = vrot.slane %v2113_v57, 2  ;;  %v2188_v35 = vrot.slane %v2187_v6, 2 }
 0x2ad   :  { %v2259_v45 = vadd.f32 %v2258_v28, %v1979_v41  ;;  %v2333_v8 = vadd.f32 %v2332_v27, %v2043_v37 }
 0x2ae   :  { %v2115_v23 = vadd.f32 %v2114_v54, %v2113_v57  ;;  %v2189_v53 = vadd.f32 %v2188_v35, %v2187_v6 }
 0x2af   :  { %v2260_v48 = vrot.slane %v2259_v45, 4  ;;  %v2334_v46 = vrot.slane %v2333_v8, 4 }
 0x2b0   :  { %v2116_v52 = vrot.slane %v2115_v23, 1  ;;  %v2190_v33 = vrot.slane %v2189_v53, 1 }
 0x2b1   :  { %v2261_v12 = vadd.f32 %v2260_v48, %v2259_v45  ;;  %v2335_v13 = vadd.f32 %v2334_v46, %v2333_v8 }
 0x2b2   :  { %v2117_v30 = vadd.f32 %v2116_v52, %v2115_v23  ;;  %v2191_v59 = vadd.f32 %v2190_v33, %v2189_v53 }
 0x2b3   :  { %v2262_v22 = vrot.slane %v2261_v12, 2  ;;  %v2336_v24 = vrot.slane %v2335_v13, 2 }
 0x2b4   :  { %v2348_v10 = vmul.f32 %v2346_v55, %v2117_v30  ;;  %v2350_v18 = vmul.f32 %v2346_v55, %v2191_v59 }
 0x2b5   :  { %v2263_v11 = vadd.f32 %v2262_v22, %v2261_v12  ;;  %v2337_v9 = vadd.f32 %v2336_v24, %v2335_v13 }
 0x2b6   :  { %v2364_v1 = vsel %vm2363_vm1, %v2348_v10, %v2347_v61 }
 0x2b7   :  { %v2264_v19 = vrot.slane %v2263_v11, 1  ;;  %v2338_v0 = vrot.slane %v2337_v9, 1  ;;  %v2366_v50 = vsel %vm2365_vm2, %v2349_v63, %v2364_v1 }
 0x2b8   :  { %v2368_v20 = vsel %vm2367_vm3, %v2350_v18, %v2366_v50 }
 0x2b9   :  { %v2265_v3 = vadd.f32 %v2264_v19, %v2263_v11  ;;  %v2339_v16 = vadd.f32 %v2338_v0, %v2337_v9  ;;  %v2370_v21 = vsel %vm2369_vm4, %v2351_v14, %v2368_v20 }
 0x2bb   :  { %v2352_v17 = vmul.f32 %v2346_v55, %v2265_v3  ;;  %v2354_v43 = vmul.f32 %v2346_v55, %v2339_v16 }
 0x2bd   :  { %v2372_v44 = vsel %vm2371_vm5, %v2352_v17, %v2370_v21 }
 0x2be   :  { %v2374_v38 = vsel %vm2373_vm6, %v2353_v4, %v2372_v44 }
 0x2bf   :  { %v2376_v25 = vsel %vm2375_vm7, %v2354_v43, %v2374_v38 }
 0x2c0   :  { %2378 = vst [vmem:[#allocation7] sm:$0xff] %v2376_v25 }
 0x2c1   :  { %2389 = dma.vmem_to_hbm [thread:$0]  %s2385_s28, 128, %s2387_s4, [#allocation4]  }
 0x2c2   :  { %3188 = dma.done.wait [#allocation4], 128  }
 0x2c3   :  { %3189 = vsyncadd [#allocation4], 4294967168 }
 0x2c4   :  { %2394 = vsyncpa [#allocation3], 1 }
 0x2c5   :  { %2395 = vsyncpa [#allocation6], 1 }
 0x2c6   :  { %2396 = vsyncpa [#allocation4], 1 }

</bundles_post_ra>
